<compile_context>
chip_gen: v6e
topology: v6e:2x2x1
jax: 0.10.0
libtpu: 0.0.40
codegen_flags: <defaults>
</compile_context>

<pallas_src>
import jax
import jax.numpy as jnp
from jax.experimental import pallas as pl
from jax.experimental.pallas import tpu as pltpu


# -----------------------------------------------------------------------------
# Pallas kernel: the whole hidden-size hot path for one batch tile.
# -----------------------------------------------------------------------------
def _layernorm(x, gamma, beta, eps=1e-5):
    mu = jnp.mean(x, axis=-1, keepdims=True)
    var = jnp.mean((x - mu) ** 2, axis=-1, keepdims=True)
    return (x - mu) * jax.lax.rsqrt(var + eps) * gamma + beta


def fusion_kernel(
    # features [TB, H]
    img_ref, txt_ref, enh_img_ref, enh_txt_ref,
    # per-sample coefficients packed as [TB, 8]:
    #   0: alpha_txt  (missing_type==1 replacement blend; 0 otherwise)
    #   1: alpha_img  (missing_type==2 replacement blend; 0 otherwise)
    #   2: s_eff      (enhancement strength, 0 if <= 0.3)
    #   3: cons_eff   (consistency if > 0.5 else 0)
    #   4: img modality weight   5: text modality weight
    #   6: overall confidence    7: pad
    scal_ref,
    # packed weights:
    #   w_hh  [7, H, H] bf16: ie_w1, ie_w2, te_w1, te_w2, attn_wv, attn_wo, gate_w2
    #   v_h   [13, H]   f32 : ie_b1, ie_g, ie_be, ie_b2, te_b1, te_g, te_be,
    #                         te_b2, attn_bv, attn_bo, gate_w1_conf, gate_b1, gate_b2
    #   w_g1  [2H, H]   bf16: vstack(gate_w1_img, gate_w1_txt)
    #   w_ff1 [2H, 2H]  bf16, w_ff2 [2H, 2H] bf16
    #   v_2h  [4, 2H]   f32 : ff_b1, ff_g, ff_be, ff_b2
    w_hh_ref, v_h_ref, w_g1_ref, w_ff1_ref, w_ff2_ref, v_2h_ref,
    # output [TB, 2H]
    out_ref,
):
    f32 = jnp.float32
    bf16 = jnp.bfloat16

    img = img_ref[...].astype(f32)
    txt = txt_ref[...].astype(f32)
    enh_img = enh_img_ref[...].astype(f32)
    enh_txt = enh_txt_ref[...].astype(f32)
    sc = scal_ref[...].astype(f32)

    tb = img.shape[0]

    a_txt = sc[:, 0:1]
    a_img = sc[:, 1:2]
    s_eff = sc[:, 2:3]
    cons = sc[:, 3:4]
    w_img = sc[:, 4:5]
    w_txt = sc[:, 5:6]
    conf = sc[:, 6:7]

    # ---- missing-type replacement (branchless; alpha==0 keeps original) ----
    final_txt = a_txt * enh_txt + (1.0 - a_txt) * txt
    final_img = a_img * enh_img + (1.0 - a_img) * img

    # ---- weight slab slices (static indices) --------------------------------
    w_ie1 = w_hh_ref[0]
    w_ie2 = w_hh_ref[1]
    w_te1 = w_hh_ref[2]
    w_te2 = w_hh_ref[3]
    w_av = w_hh_ref[4]
    w_ao = w_hh_ref[5]
    w_g2 = w_hh_ref[6]

    vh = v_h_ref[...].astype(f32)
    b_ie1, g_ie, be_ie, b_ie2 = vh[0:1], vh[1:2], vh[2:3], vh[3:4]
    b_te1, g_te, be_te, b_te2 = vh[4:5], vh[5:6], vh[6:7], vh[7:8]
    b_av, b_ao = vh[8:9], vh[9:10]
    wg_conf, b_g1, b_g2 = vh[10:11], vh[11:12], vh[12:13]

    def dot(x, w):
        # bf16 MXU operands, f32 accumulation.
        return jnp.dot(x.astype(bf16), w, preferred_element_type=f32)

    # ---- quality-guided enhancement -----------------------------------------
    def enhancer(x, w1, b1, g, be, w2, b2):
        h = dot(x, w1) + b1
        h = _layernorm(h, g, be)
        h = jnp.maximum(h, 0.0)
        return dot(h, w2) + b2

    e_img = final_img + s_eff * enhancer(final_img, w_ie1, b_ie1, g_ie, be_ie,
                                         w_ie2, b_ie2)
    e_txt = final_txt + s_eff * enhancer(final_txt, w_te1, b_te1, g_te, be_te,
                                         w_te2, b_te2)

    # ---- adaptive cross-modal attention (seq-len-1 => out_proj(v_proj(kv))) --
    # Same wv/wo for both directions -> batch along sublanes ([2*TB, H]).
    kv = jnp.concatenate([e_txt, e_img], axis=0)
    h_att = dot(kv, w_av) + b_av
    att = dot(h_att, w_ao) + b_ao
    img_attended = att[:tb]   # query=img attends key/value=text
    txt_attended = att[tb:]   # query=text attends key/value=img

    att_img = cons * img_attended + (1.0 - cons) * e_img
    att_txt = cons * txt_attended + (1.0 - cons) * e_txt

    # ---- modality weighting ---------------------------------------------------
    weighted_img = w_img * att_img
    weighted_txt = w_txt * att_txt

    # ---- adaptive feature gating (fused K=2H matmul) --------------------------
    gate_in = jnp.concatenate([weighted_img, weighted_txt], axis=-1)   # [TB, 2H]
    gate_pre = dot(gate_in, w_g1_ref[...]) + conf * wg_conf + b_g1
    gate_h = jnp.maximum(gate_pre, 0.0)
    gate = jax.nn.sigmoid(dot(gate_h, w_g2) + b_g2)

    gated = jnp.concatenate([gate * weighted_img, (1.0 - gate) * weighted_txt],
                            axis=-1)                                   # [TB, 2H]

    # ---- final fusion net ------------------------------------------------------
    v2 = v_2h_ref[...].astype(f32)
    b_f1, g_f, be_f, b_f2 = v2[0:1], v2[1:2], v2[2:3], v2[3:4]

    h = dot(gated, w_ff1_ref[...]) + b_f1
    h = _layernorm(h, g_f, be_f)
    h = jnp.maximum(h, 0.0)
    out = dot(h, w_ff2_ref[...]) + b_f2

    out_ref[...] = out.astype(out_ref.dtype)


# -----------------------------------------------------------------------------
# Wrapper
# -----------------------------------------------------------------------------
def _round_up(x, m):
    return (x + m - 1) // m * m


def updated_quality_guided_fusion(
    image_feat, text_feat, enhanced_image_feat, enhanced_text_feat,
    quality_vec, relevance_vec, overall_conf, consistency,
    gen_conf_text, gen_conf_img, missing_type, params,
    block_batch=128):
    """Forward pass. Returns [B, 2H] fused features (float32)."""
    B, H = image_feat.shape
    p = params
    f32 = jnp.float32
    bf16 = jnp.bfloat16

    # --- tiny per-sample weight nets (scalar glue, plain JAX) ----------------
    def relu(x):
        return jnp.maximum(x, 0.0)

    qh = relu(quality_vec @ p["qw_w1"] + p["qw_b1"])
    qh = relu(qh @ p["qw_w2"] + p["qw_b2"])
    quality_weights = jax.nn.softmax(qh @ p["qw_w3"] + p["qw_b3"], axis=-1)

    th = relu(relevance_vec @ p["tr_w1"] + p["tr_b1"])
    task_weights = jax.nn.softmax(th @ p["tr_w2"] + p["tr_b2"], axis=-1)

    modality_weights = 0.6 * quality_weights + 0.4 * task_weights  # [B, 2]

    # --- fold per-sample branch logic into branchless coefficients -----------
    gen_ct = gen_conf_text.astype(f32)
    gen_ci = gen_conf_img.astype(f32)
    conf = overall_conf.astype(f32)
    cons = consistency.astype(f32)
    is_m1 = missing_type == 1
    is_m2 = missing_type == 2

    alpha_txt = jnp.where(is_m1, jnp.where(gen_ct > 0.6, 1.0, gen_ct), 0.0)
    alpha_img = jnp.where(is_m2, jnp.where(gen_ci > 0.6, 1.0, gen_ci), 0.0)
    strength = jnp.maximum(0.1, 1.0 - conf)
    s_eff = jnp.where(strength > 0.3, strength, 0.0)
    cons_eff = jnp.where(cons > 0.5, cons, 0.0)

    scalars = jnp.stack(
        [alpha_txt, alpha_img, s_eff, cons_eff,
         modality_weights[:, 0], modality_weights[:, 1],
         conf, jnp.zeros_like(conf)],
        axis=-1,
    ).astype(f32)                                                   # [B, 8]

    # --- pack parameters into a few large slabs (bf16 matmul weights) --------
    w_hh = jnp.stack([p["ie_w1"], p["ie_w2"], p["te_w1"], p["te_w2"],
                      p["attn_wv"], p["attn_wo"], p["gate_w2"]]).astype(bf16)
    v_h = jnp.concatenate(
        [p["ie_b1"], p["ie_g"], p["ie_be"], p["ie_b2"],
         p["te_b1"], p["te_g"], p["te_be"], p["te_b2"],
         p["attn_bv"], p["attn_bo"], p["gate_w1_conf"],
         p["gate_b1"], p["gate_b2"]], axis=0).astype(f32)           # [13, H]
    w_g1 = jnp.concatenate([p["gate_w1_img"], p["gate_w1_txt"]],
                           axis=0).astype(bf16)                     # [2H, H]
    w_ff1 = p["ff_w1"].astype(bf16)                                 # [2H, 2H]
    w_ff2 = p["ff_w2"].astype(bf16)                                 # [2H, 2H]
    v_2h = jnp.concatenate([p["ff_b1"], p["ff_g"], p["ff_be"], p["ff_b2"]],
                           axis=0).astype(f32)                      # [4, 2H]

    # --- batch tiling: sublane-dense tiles, weights VMEM-resident ------------
    tb = min(block_batch, _round_up(B, 8))
    b_pad = _round_up(B, tb)
    n_tiles = b_pad // tb

    def pad_b(x):
        if x.shape[0] == b_pad:
            return x
        pad = ((0, b_pad - x.shape[0]),) + ((0, 0),) * (x.ndim - 1)
        return jnp.pad(x, pad)

    img = pad_b(image_feat.astype(f32))
    txt = pad_b(text_feat.astype(f32))
    e_img = pad_b(enhanced_image_feat.astype(f32))
    e_txt = pad_b(enhanced_text_feat.astype(f32))
    scalars = pad_b(scalars)

    feat_spec = pl.BlockSpec((tb, H), lambda i: (i, 0))
    scal_spec = pl.BlockSpec((tb, scalars.shape[1]), lambda i: (i, 0))

    def param_spec(shape):
        nd = len(shape)
        return pl.BlockSpec(shape, lambda i, _nd=nd: (0,) * _nd)

    out = pl.pallas_call(
        fusion_kernel,
        out_shape=jax.ShapeDtypeStruct((b_pad, 2 * H), jnp.float32),
        grid=(n_tiles,),
        in_specs=[feat_spec, feat_spec, feat_spec, feat_spec, scal_spec,
                  param_spec(w_hh.shape), param_spec(v_h.shape),
                  param_spec(w_g1.shape), param_spec(w_ff1.shape),
                  param_spec(w_ff2.shape), param_spec(v_2h.shape)],
        out_specs=pl.BlockSpec((tb, 2 * H), lambda i: (i, 0)),
        compiler_params=pltpu.CompilerParams(
            dimension_semantics=("parallel",)),
    )(img, txt, e_img, e_txt, scalars, w_hh, v_h, w_g1, w_ff1, w_ff2, v_2h)

    return out[:B]


# -----------------------------------------------------------------------------
# Deterministic synthetic parameters
# -----------------------------------------------------------------------------
def init_params(key, hidden):
    H = hidden
    ks = iter(jax.random.split(key, 64))

    def lin(in_f, out_f):
        w = jax.random.normal(next(ks), (in_f, out_f), jnp.float32) * 0.02
        b = jnp.zeros((1, out_f), jnp.float32)
        return w, b

    p = {}
    # quality_weight_calculator: 6 -> 32 -> 16 -> 2 (softmax)
    p["qw_w1"], p["qw_b1"] = lin(6, 32)
    p["qw_w2"], p["qw_b2"] = lin(32, 16)
    p["qw_w3"], p["qw_b3"] = lin(16, 2)
    # task_relevance_weight_net: 3 -> 16 -> 2 (softmax)
    p["tr_w1"], p["tr_b1"] = lin(3, 16)
    p["tr_w2"], p["tr_b2"] = lin(16, 2)
    # image / text enhancers
    for pre in ("ie", "te"):
        p[pre + "_w1"], p[pre + "_b1"] = lin(H, H)
        p[pre + "_g"] = jnp.ones((1, H), jnp.float32)
        p[pre + "_be"] = jnp.zeros((1, H), jnp.float32)
        p[pre + "_w2"], p[pre + "_b2"] = lin(H, H)
    # cross-modal attention (only v_proj / out_proj matter for seq-len-1)
    p["attn_wv"], p["attn_bv"] = lin(H, H)
    p["attn_wo"], p["attn_bo"] = lin(H, H)
    # adaptive gate: Linear(2H+1, H) split into img/text/conf blocks
    p["gate_w1_img"], _ = lin(H, H)
    p["gate_w1_txt"], _ = lin(H, H)
    p["gate_w1_conf"] = jax.random.normal(next(ks), (1, H), jnp.float32) * 0.02
    p["gate_b1"] = jnp.zeros((1, H), jnp.float32)
    p["gate_w2"], p["gate_b2"] = lin(H, H)
    # final fusion net
    p["ff_w1"], p["ff_b1"] = lin(2 * H, 2 * H)
    p["ff_g"] = jnp.ones((1, 2 * H), jnp.float32)
    p["ff_be"] = jnp.zeros((1, 2 * H), jnp.float32)
    p["ff_w2"], p["ff_b2"] = lin(2 * H, 2 * H)
    return p


# -----------------------------------------------------------------------------
# Main
# -----------------------------------------------------------------------------
if __name__ == "__main__":
    B, H = 4, 128
    key = jax.random.PRNGKey(0)
    k_feat, k_param, k_q = jax.random.split(key, 3)

    kf = jax.random.split(k_feat, 4)
    image_feat = jax.random.normal(kf[0], (B, H), jnp.float32)
    text_feat = jax.random.normal(kf[1], (B, H), jnp.float32)
    enhanced_image_feat = jax.random.normal(kf[2], (B, H), jnp.float32)
    enhanced_text_feat = jax.random.normal(kf[3], (B, H), jnp.float32)

    params = init_params(k_param, H)

    # Synthetic "quality_scores" (one scalar per dict field, per sample),
    # chosen to exercise all branches.
    kq = jax.random.split(k_q, 2)
    quality_vec = jax.random.uniform(kq[0], (B, 6), jnp.float32)
    relevance_vec = jax.random.uniform(kq[1], (B, 3), jnp.float32)
    overall_conf = jnp.array([0.95, 0.40, 0.55, 0.20], jnp.float32)
    consistency = jnp.array([0.80, 0.30, 0.60, 0.90], jnp.float32)
    gen_conf_text = jnp.array([0.70, 0.50, 0.65, 0.30], jnp.float32)
    gen_conf_img = jnp.array([0.20, 0.90, 0.40, 0.75], jnp.float32)
    missing_type = jnp.array([0, 1, 2, 1], jnp.int32)

    out = updated_quality_guided_fusion(
        image_feat, text_feat, enhanced_image_feat, enhanced_text_feat,
        quality_vec, relevance_vec, overall_conf, consistency,
        gen_conf_text, gen_conf_img, missing_type, params)

    out = jax.block_until_ready(out)
    assert out.shape == (B, 2 * H), out.shape
    assert bool(jnp.all(jnp.isfinite(out)))
    print("KERNEL_OK")
</pallas_src>

<mosaic_0001>
module attributes {stable_mosaic.version = 11 : i64} {
  func.func @fusion_kernel(%arg0: i32, %arg1: memref<8x128xf32, #tpu.memory_space<vmem>>, %arg2: memref<8x128xf32, #tpu.memory_space<vmem>>, %arg3: memref<8x128xf32, #tpu.memory_space<vmem>>, %arg4: memref<8x128xf32, #tpu.memory_space<vmem>>, %arg5: memref<8x8xf32, #tpu.memory_space<vmem>>, %arg6: memref<7x128x128xbf16, #tpu.memory_space<vmem>>, %arg7: memref<13x128xf32, #tpu.memory_space<vmem>>, %arg8: memref<256x128xbf16, #tpu.memory_space<vmem>>, %arg9: memref<256x256xbf16, #tpu.memory_space<vmem>>, %arg10: memref<256x256xbf16, #tpu.memory_space<vmem>>, %arg11: memref<4x256xf32, #tpu.memory_space<vmem>>, %arg12: memref<8x256xf32, #tpu.memory_space<vmem>>) attributes {dimension_semantics = [#tpu.dimension_semantics<parallel>], iteration_bounds = array<i64: 1>, scalar_prefetch = 0 : i64, scratch_operands = 0 : i64, tpu.core_type = #tpu.core_type<tc>, window_params = [{transform_indices = @transform_0, window_bounds = array<i64: 8, 128>}, {transform_indices = @transform_1, window_bounds = array<i64: 8, 128>}, {transform_indices = @transform_2, window_bounds = array<i64: 8, 128>}, {transform_indices = @transform_3, window_bounds = array<i64: 8, 128>}, {transform_indices = @transform_4, window_bounds = array<i64: 8, 8>}, {pipeline_mode = #tpu.pipeline_mode<synchronous>, transform_indices = @transform_5, window_bounds = array<i64: 7, 128, 128>}, {pipeline_mode = #tpu.pipeline_mode<synchronous>, transform_indices = @transform_6, window_bounds = array<i64: 13, 128>}, {pipeline_mode = #tpu.pipeline_mode<synchronous>, transform_indices = @transform_7, window_bounds = array<i64: 256, 128>}, {pipeline_mode = #tpu.pipeline_mode<synchronous>, transform_indices = @transform_8, window_bounds = array<i64: 256, 256>}, {pipeline_mode = #tpu.pipeline_mode<synchronous>, transform_indices = @transform_9, window_bounds = array<i64: 256, 256>}, {pipeline_mode = #tpu.pipeline_mode<synchronous>, transform_indices = @transform_10, window_bounds = array<i64: 4, 256>}, {transform_indices = @transform_11, window_bounds = array<i64: 8, 256>}]} {
    %c0 = arith.constant 0 : index
    %c0_0 = arith.constant 0 : index
    %0 = vector.load %arg1[%c0, %c0_0] : memref<8x128xf32, #tpu.memory_space<vmem>>, vector<8x128xf32>
    %c0_1 = arith.constant 0 : index
    %c0_2 = arith.constant 0 : index
    %1 = vector.load %arg2[%c0_1, %c0_2] : memref<8x128xf32, #tpu.memory_space<vmem>>, vector<8x128xf32>
    %c0_3 = arith.constant 0 : index
    %c0_4 = arith.constant 0 : index
    %2 = vector.load %arg3[%c0_3, %c0_4] : memref<8x128xf32, #tpu.memory_space<vmem>>, vector<8x128xf32>
    %c0_5 = arith.constant 0 : index
    %c0_6 = arith.constant 0 : index
    %3 = vector.load %arg4[%c0_5, %c0_6] : memref<8x128xf32, #tpu.memory_space<vmem>>, vector<8x128xf32>
    %c0_7 = arith.constant 0 : index
    %c0_8 = arith.constant 0 : index
    %4 = vector.load %arg5[%c0_7, %c0_8] : memref<8x8xf32, #tpu.memory_space<vmem>>, vector<8x8xf32>
    %5 = vector.extract_strided_slice %4 {offsets = [0, 0], sizes = [8, 1], strides = [1, 1]} : vector<8x8xf32> to vector<8x1xf32>
    %6 = vector.extract_strided_slice %4 {offsets = [0, 1], sizes = [8, 1], strides = [1, 1]} : vector<8x8xf32> to vector<8x1xf32>
    %7 = vector.extract_strided_slice %4 {offsets = [0, 2], sizes = [8, 1], strides = [1, 1]} : vector<8x8xf32> to vector<8x1xf32>
    %8 = vector.extract_strided_slice %4 {offsets = [0, 3], sizes = [8, 1], strides = [1, 1]} : vector<8x8xf32> to vector<8x1xf32>
    %9 = vector.extract_strided_slice %4 {offsets = [0, 4], sizes = [8, 1], strides = [1, 1]} : vector<8x8xf32> to vector<8x1xf32>
    %10 = vector.extract_strided_slice %4 {offsets = [0, 5], sizes = [8, 1], strides = [1, 1]} : vector<8x8xf32> to vector<8x1xf32>
    %11 = vector.extract_strided_slice %4 {offsets = [0, 6], sizes = [8, 1], strides = [1, 1]} : vector<8x8xf32> to vector<8x1xf32>
    %12 = vector.broadcast %5 : vector<8x1xf32> to vector<8x128xf32>
    %13 = arith.mulf %12, %3 : vector<8x128xf32>
    %cst = arith.constant 1.000000e+00 : f32
    %14 = vector.broadcast %cst : f32 to vector<8x1xf32>
    %15 = arith.subf %14, %5 : vector<8x1xf32>
    %16 = vector.broadcast %15 : vector<8x1xf32> to vector<8x128xf32>
    %17 = arith.mulf %16, %1 : vector<8x128xf32>
    %18 = arith.addf %13, %17 : vector<8x128xf32>
    %19 = vector.broadcast %6 : vector<8x1xf32> to vector<8x128xf32>
    %20 = arith.mulf %19, %2 : vector<8x128xf32>
    %cst_9 = arith.constant 1.000000e+00 : f32
    %21 = vector.broadcast %cst_9 : f32 to vector<8x1xf32>
    %22 = arith.subf %21, %6 : vector<8x1xf32>
    %23 = vector.broadcast %22 : vector<8x1xf32> to vector<8x128xf32>
    %24 = arith.mulf %23, %0 : vector<8x128xf32>
    %25 = arith.addf %20, %24 : vector<8x128xf32>
    %c0_10 = arith.constant 0 : index
    %c0_11 = arith.constant 0 : index
    %c0_12 = arith.constant 0 : index
    %26 = vector.load %arg6[%c0_10, %c0_11, %c0_12] : memref<7x128x128xbf16, #tpu.memory_space<vmem>>, vector<1x128x128xbf16>
    %27 = vector.shape_cast %26 : vector<1x128x128xbf16> to vector<128x128xbf16>
    %c1 = arith.constant 1 : index
    %c0_13 = arith.constant 0 : index
    %c0_14 = arith.constant 0 : index
    %28 = vector.load %arg6[%c1, %c0_13, %c0_14] : memref<7x128x128xbf16, #tpu.memory_space<vmem>>, vector<1x128x128xbf16>
    %29 = vector.shape_cast %28 : vector<1x128x128xbf16> to vector<128x128xbf16>
    %c2 = arith.constant 2 : index
    %c0_15 = arith.constant 0 : index
    %c0_16 = arith.constant 0 : index
    %30 = vector.load %arg6[%c2, %c0_15, %c0_16] : memref<7x128x128xbf16, #tpu.memory_space<vmem>>, vector<1x128x128xbf16>
    %31 = vector.shape_cast %30 : vector<1x128x128xbf16> to vector<128x128xbf16>
    %c3 = arith.constant 3 : index
    %c0_17 = arith.constant 0 : index
    %c0_18 = arith.constant 0 : index
    %32 = vector.load %arg6[%c3, %c0_17, %c0_18] : memref<7x128x128xbf16, #tpu.memory_space<vmem>>, vector<1x128x128xbf16>
    %33 = vector.shape_cast %32 : vector<1x128x128xbf16> to vector<128x128xbf16>
    %c4 = arith.constant 4 : index
    %c0_19 = arith.constant 0 : index
    %c0_20 = arith.constant 0 : index
    %34 = vector.load %arg6[%c4, %c0_19, %c0_20] : memref<7x128x128xbf16, #tpu.memory_space<vmem>>, vector<1x128x128xbf16>
    %35 = vector.shape_cast %34 : vector<1x128x128xbf16> to vector<128x128xbf16>
    %c5 = arith.constant 5 : index
    %c0_21 = arith.constant 0 : index
    %c0_22 = arith.constant 0 : index
    %36 = vector.load %arg6[%c5, %c0_21, %c0_22] : memref<7x128x128xbf16, #tpu.memory_space<vmem>>, vector<1x128x128xbf16>
    %37 = vector.shape_cast %36 : vector<1x128x128xbf16> to vector<128x128xbf16>
    %c6 = arith.constant 6 : index
    %c0_23 = arith.constant 0 : index
    %c0_24 = arith.constant 0 : index
    %38 = vector.load %arg6[%c6, %c0_23, %c0_24] : memref<7x128x128xbf16, #tpu.memory_space<vmem>>, vector<1x128x128xbf16>
    %39 = vector.shape_cast %38 : vector<1x128x128xbf16> to vector<128x128xbf16>
    %c0_25 = arith.constant 0 : index
    %c0_26 = arith.constant 0 : index
    %40 = vector.load %arg7[%c0_25, %c0_26] : memref<13x128xf32, #tpu.memory_space<vmem>>, vector<13x128xf32>
    %41 = vector.extract_strided_slice %40 {offsets = [0, 0], sizes = [1, 128], strides = [1, 1]} : vector<13x128xf32> to vector<1x128xf32>
    %42 = vector.extract_strided_slice %40 {offsets = [1, 0], sizes = [1, 128], strides = [1, 1]} : vector<13x128xf32> to vector<1x128xf32>
    %43 = vector.extract_strided_slice %40 {offsets = [2, 0], sizes = [1, 128], strides = [1, 1]} : vector<13x128xf32> to vector<1x128xf32>
    %44 = vector.extract_strided_slice %40 {offsets = [3, 0], sizes = [1, 128], strides = [1, 1]} : vector<13x128xf32> to vector<1x128xf32>
    %45 = vector.extract_strided_slice %40 {offsets = [4, 0], sizes = [1, 128], strides = [1, 1]} : vector<13x128xf32> to vector<1x128xf32>
    %46 = vector.extract_strided_slice %40 {offsets = [5, 0], sizes = [1, 128], strides = [1, 1]} : vector<13x128xf32> to vector<1x128xf32>
    %47 = vector.extract_strided_slice %40 {offsets = [6, 0], sizes = [1, 128], strides = [1, 1]} : vector<13x128xf32> to vector<1x128xf32>
    %48 = vector.extract_strided_slice %40 {offsets = [7, 0], sizes = [1, 128], strides = [1, 1]} : vector<13x128xf32> to vector<1x128xf32>
    %49 = vector.extract_strided_slice %40 {offsets = [8, 0], sizes = [1, 128], strides = [1, 1]} : vector<13x128xf32> to vector<1x128xf32>
    %50 = vector.extract_strided_slice %40 {offsets = [9, 0], sizes = [1, 128], strides = [1, 1]} : vector<13x128xf32> to vector<1x128xf32>
    %51 = vector.extract_strided_slice %40 {offsets = [10, 0], sizes = [1, 128], strides = [1, 1]} : vector<13x128xf32> to vector<1x128xf32>
    %52 = vector.extract_strided_slice %40 {offsets = [11, 0], sizes = [1, 128], strides = [1, 1]} : vector<13x128xf32> to vector<1x128xf32>
    %53 = vector.extract_strided_slice %40 {offsets = [12, 0], sizes = [1, 128], strides = [1, 1]} : vector<13x128xf32> to vector<1x128xf32>
    %54 = arith.truncf %25 : vector<8x128xf32> to vector<8x128xbf16>
    %cst_27 = arith.constant dense<0.000000e+00> : vector<8x128xf32>
    %55 = tpu.matmul %54, %27, %cst_27 {dimension_numbers = #tpu.dot_dimension_numbers<[1], [0], [0], [1], [0, 0, 1, 1], [], []>} : vector<8x128xbf16>, vector<128x128xbf16>, vector<8x128xf32> -> vector<8x128xf32>
    %56 = vector.broadcast %41 : vector<1x128xf32> to vector<8x128xf32>
    %57 = arith.addf %55, %56 : vector<8x128xf32>
    %cst_28 = arith.constant dense<0.000000e+00> : vector<8xf32>
    %58 = vector.multi_reduction <add>, %57, %cst_28 [1] : vector<8x128xf32> to vector<8xf32>
    %59 = vector.shape_cast %58 : vector<8xf32> to vector<8x1xf32>
    %cst_29 = arith.constant 1.280000e+02 : f32
    %60 = vector.broadcast %cst_29 : f32 to vector<8x1xf32>
    %61 = arith.divf %59, %60 : vector<8x1xf32>
    %62 = vector.broadcast %61 : vector<8x1xf32> to vector<8x128xf32>
    %63 = arith.subf %57, %62 : vector<8x128xf32>
    %64 = arith.mulf %63, %63 : vector<8x128xf32>
    %cst_30 = arith.constant dense<0.000000e+00> : vector<8xf32>
    %65 = vector.multi_reduction <add>, %64, %cst_30 [1] : vector<8x128xf32> to vector<8xf32>
    %66 = vector.shape_cast %65 : vector<8xf32> to vector<8x1xf32>
    %cst_31 = arith.constant 1.280000e+02 : f32
    %67 = vector.broadcast %cst_31 : f32 to vector<8x1xf32>
    %68 = arith.divf %66, %67 : vector<8x1xf32>
    %69 = vector.broadcast %61 : vector<8x1xf32> to vector<8x128xf32>
    %70 = arith.subf %57, %69 : vector<8x128xf32>
    %cst_32 = arith.constant 9.99999974E-6 : f32
    %71 = vector.broadcast %cst_32 : f32 to vector<8x1xf32>
    %72 = arith.addf %68, %71 : vector<8x1xf32>
    %73 = math.rsqrt %72 : vector<8x1xf32>
    %74 = vector.broadcast %73 : vector<8x1xf32> to vector<8x128xf32>
    %75 = arith.mulf %70, %74 : vector<8x128xf32>
    %76 = vector.broadcast %42 : vector<1x128xf32> to vector<8x128xf32>
    %77 = arith.mulf %75, %76 : vector<8x128xf32>
    %78 = vector.broadcast %43 : vector<1x128xf32> to vector<8x128xf32>
    %79 = arith.addf %77, %78 : vector<8x128xf32>
    %cst_33 = arith.constant 0.000000e+00 : f32
    %80 = vector.broadcast %cst_33 : f32 to vector<8x128xf32>
    %81 = arith.maximumf %79, %80 : vector<8x128xf32>
    %82 = arith.truncf %81 : vector<8x128xf32> to vector<8x128xbf16>
    %cst_34 = arith.constant dense<0.000000e+00> : vector<8x128xf32>
    %83 = tpu.matmul %82, %29, %cst_34 {dimension_numbers = #tpu.dot_dimension_numbers<[1], [0], [0], [1], [0, 0, 1, 1], [], []>} : vector<8x128xbf16>, vector<128x128xbf16>, vector<8x128xf32> -> vector<8x128xf32>
    %84 = vector.broadcast %44 : vector<1x128xf32> to vector<8x128xf32>
    %85 = arith.addf %83, %84 : vector<8x128xf32>
    %86 = vector.broadcast %7 : vector<8x1xf32> to vector<8x128xf32>
    %87 = arith.mulf %86, %85 : vector<8x128xf32>
    %88 = arith.addf %25, %87 : vector<8x128xf32>
    %89 = arith.truncf %18 : vector<8x128xf32> to vector<8x128xbf16>
    %cst_35 = arith.constant dense<0.000000e+00> : vector<8x128xf32>
    %90 = tpu.matmul %89, %31, %cst_35 {dimension_numbers = #tpu.dot_dimension_numbers<[1], [0], [0], [1], [0, 0, 1, 1], [], []>} : vector<8x128xbf16>, vector<128x128xbf16>, vector<8x128xf32> -> vector<8x128xf32>
    %91 = vector.broadcast %45 : vector<1x128xf32> to vector<8x128xf32>
    %92 = arith.addf %90, %91 : vector<8x128xf32>
    %cst_36 = arith.constant dense<0.000000e+00> : vector<8xf32>
    %93 = vector.multi_reduction <add>, %92, %cst_36 [1] : vector<8x128xf32> to vector<8xf32>
    %94 = vector.shape_cast %93 : vector<8xf32> to vector<8x1xf32>
    %cst_37 = arith.constant 1.280000e+02 : f32
    %95 = vector.broadcast %cst_37 : f32 to vector<8x1xf32>
    %96 = arith.divf %94, %95 : vector<8x1xf32>
    %97 = vector.broadcast %96 : vector<8x1xf32> to vector<8x128xf32>
    %98 = arith.subf %92, %97 : vector<8x128xf32>
    %99 = arith.mulf %98, %98 : vector<8x128xf32>
    %cst_38 = arith.constant dense<0.000000e+00> : vector<8xf32>
    %100 = vector.multi_reduction <add>, %99, %cst_38 [1] : vector<8x128xf32> to vector<8xf32>
    %101 = vector.shape_cast %100 : vector<8xf32> to vector<8x1xf32>
    %cst_39 = arith.constant 1.280000e+02 : f32
    %102 = vector.broadcast %cst_39 : f32 to vector<8x1xf32>
    %103 = arith.divf %101, %102 : vector<8x1xf32>
    %104 = vector.broadcast %96 : vector<8x1xf32> to vector<8x128xf32>
    %105 = arith.subf %92, %104 : vector<8x128xf32>
    %cst_40 = arith.constant 9.99999974E-6 : f32
    %106 = vector.broadcast %cst_40 : f32 to vector<8x1xf32>
    %107 = arith.addf %103, %106 : vector<8x1xf32>
    %108 = math.rsqrt %107 : vector<8x1xf32>
    %109 = vector.broadcast %108 : vector<8x1xf32> to vector<8x128xf32>
    %110 = arith.mulf %105, %109 : vector<8x128xf32>
    %111 = vector.broadcast %46 : vector<1x128xf32> to vector<8x128xf32>
    %112 = arith.mulf %110, %111 : vector<8x128xf32>
    %113 = vector.broadcast %47 : vector<1x128xf32> to vector<8x128xf32>
    %114 = arith.addf %112, %113 : vector<8x128xf32>
    %cst_41 = arith.constant 0.000000e+00 : f32
    %115 = vector.broadcast %cst_41 : f32 to vector<8x128xf32>
    %116 = arith.maximumf %114, %115 : vector<8x128xf32>
    %117 = arith.truncf %116 : vector<8x128xf32> to vector<8x128xbf16>
    %cst_42 = arith.constant dense<0.000000e+00> : vector<8x128xf32>
    %118 = tpu.matmul %117, %33, %cst_42 {dimension_numbers = #tpu.dot_dimension_numbers<[1], [0], [0], [1], [0, 0, 1, 1], [], []>} : vector<8x128xbf16>, vector<128x128xbf16>, vector<8x128xf32> -> vector<8x128xf32>
    %119 = vector.broadcast %48 : vector<1x128xf32> to vector<8x128xf32>
    %120 = arith.addf %118, %119 : vector<8x128xf32>
    %121 = vector.broadcast %7 : vector<8x1xf32> to vector<8x128xf32>
    %122 = arith.mulf %121, %120 : vector<8x128xf32>
    %123 = arith.addf %18, %122 : vector<8x128xf32>
    %124 = tpu.concatenate %123, %88 in 0 : vector<8x128xf32>, vector<8x128xf32> -> vector<16x128xf32>
    %125 = arith.truncf %124 : vector<16x128xf32> to vector<16x128xbf16>
    %cst_43 = arith.constant dense<0.000000e+00> : vector<16x128xf32>
    %126 = tpu.matmul %125, %35, %cst_43 {dimension_numbers = #tpu.dot_dimension_numbers<[1], [0], [0], [1], [0, 0, 1, 1], [], []>} : vector<16x128xbf16>, vector<128x128xbf16>, vector<16x128xf32> -> vector<16x128xf32>
    %127 = vector.broadcast %49 : vector<1x128xf32> to vector<16x128xf32>
    %128 = arith.addf %126, %127 : vector<16x128xf32>
    %129 = arith.truncf %128 : vector<16x128xf32> to vector<16x128xbf16>
    %cst_44 = arith.constant dense<0.000000e+00> : vector<16x128xf32>
    %130 = tpu.matmul %129, %37, %cst_44 {dimension_numbers = #tpu.dot_dimension_numbers<[1], [0], [0], [1], [0, 0, 1, 1], [], []>} : vector<16x128xbf16>, vector<128x128xbf16>, vector<16x128xf32> -> vector<16x128xf32>
    %131 = vector.broadcast %50 : vector<1x128xf32> to vector<16x128xf32>
    %132 = arith.addf %130, %131 : vector<16x128xf32>
    %133 = vector.extract_strided_slice %132 {offsets = [0, 0], sizes = [8, 128], strides = [1, 1]} : vector<16x128xf32> to vector<8x128xf32>
    %134 = vector.extract_strided_slice %132 {offsets = [8, 0], sizes = [8, 128], strides = [1, 1]} : vector<16x128xf32> to vector<8x128xf32>
    %135 = vector.broadcast %8 : vector<8x1xf32> to vector<8x128xf32>
    %136 = arith.mulf %135, %133 : vector<8x128xf32>
    %cst_45 = arith.constant 1.000000e+00 : f32
    %137 = vector.broadcast %cst_45 : f32 to vector<8x1xf32>
    %138 = arith.subf %137, %8 : vector<8x1xf32>
    %139 = vector.broadcast %138 : vector<8x1xf32> to vector<8x128xf32>
    %140 = arith.mulf %139, %88 : vector<8x128xf32>
    %141 = arith.addf %136, %140 : vector<8x128xf32>
    %142 = vector.broadcast %8 : vector<8x1xf32> to vector<8x128xf32>
    %143 = arith.mulf %142, %134 : vector<8x128xf32>
    %cst_46 = arith.constant 1.000000e+00 : f32
    %144 = vector.broadcast %cst_46 : f32 to vector<8x1xf32>
    %145 = arith.subf %144, %8 : vector<8x1xf32>
    %146 = vector.broadcast %145 : vector<8x1xf32> to vector<8x128xf32>
    %147 = arith.mulf %146, %123 : vector<8x128xf32>
    %148 = arith.addf %143, %147 : vector<8x128xf32>
    %149 = vector.broadcast %9 : vector<8x1xf32> to vector<8x128xf32>
    %150 = arith.mulf %149, %141 : vector<8x128xf32>
    %151 = vector.broadcast %10 : vector<8x1xf32> to vector<8x128xf32>
    %152 = arith.mulf %151, %148 : vector<8x128xf32>
    %153 = tpu.concatenate %150, %152 in 1 : vector<8x128xf32>, vector<8x128xf32> -> vector<8x256xf32>
    %c0_47 = arith.constant 0 : index
    %c0_48 = arith.constant 0 : index
    %154 = vector.load %arg8[%c0_47, %c0_48] : memref<256x128xbf16, #tpu.memory_space<vmem>>, vector<256x128xbf16>
    %155 = arith.truncf %153 : vector<8x256xf32> to vector<8x256xbf16>
    %cst_49 = arith.constant dense<0.000000e+00> : vector<8x128xf32>
    %156 = tpu.matmul %155, %154, %cst_49 {dimension_numbers = #tpu.dot_dimension_numbers<[1], [0], [0], [1], [0, 0, 1, 1], [], []>} : vector<8x256xbf16>, vector<256x128xbf16>, vector<8x128xf32> -> vector<8x128xf32>
    %157 = vector.broadcast %11 : vector<8x1xf32> to vector<8x128xf32>
    %158 = vector.broadcast %51 : vector<1x128xf32> to vector<8x128xf32>
    %159 = arith.mulf %157, %158 : vector<8x128xf32>
    %160 = arith.addf %156, %159 : vector<8x128xf32>
    %161 = vector.broadcast %52 : vector<1x128xf32> to vector<8x128xf32>
    %162 = arith.addf %160, %161 : vector<8x128xf32>
    %cst_50 = arith.constant 0.000000e+00 : f32
    %163 = vector.broadcast %cst_50 : f32 to vector<8x128xf32>
    %164 = arith.maximumf %162, %163 : vector<8x128xf32>
    %165 = arith.truncf %164 : vector<8x128xf32> to vector<8x128xbf16>
    %cst_51 = arith.constant dense<0.000000e+00> : vector<8x128xf32>
    %166 = tpu.matmul %165, %39, %cst_51 {dimension_numbers = #tpu.dot_dimension_numbers<[1], [0], [0], [1], [0, 0, 1, 1], [], []>} : vector<8x128xbf16>, vector<128x128xbf16>, vector<8x128xf32> -> vector<8x128xf32>
    %167 = vector.broadcast %53 : vector<1x128xf32> to vector<8x128xf32>
    %168 = arith.addf %166, %167 : vector<8x128xf32>
    %169 = arith.negf %168 : vector<8x128xf32>
    %170 = math.exp %169 : vector<8x128xf32>
    %cst_52 = arith.constant 1.000000e+00 : f32
    %171 = vector.broadcast %cst_52 : f32 to vector<8x128xf32>
    %172 = arith.addf %171, %170 : vector<8x128xf32>
    %173 = arith.divf %171, %172 : vector<8x128xf32>
    %174 = arith.mulf %173, %150 : vector<8x128xf32>
    %cst_53 = arith.constant 1.000000e+00 : f32
    %175 = vector.broadcast %cst_53 : f32 to vector<8x128xf32>
    %176 = arith.subf %175, %173 : vector<8x128xf32>
    %177 = arith.mulf %176, %152 : vector<8x128xf32>
    %178 = tpu.concatenate %174, %177 in 1 : vector<8x128xf32>, vector<8x128xf32> -> vector<8x256xf32>
    %c0_54 = arith.constant 0 : index
    %c0_55 = arith.constant 0 : index
    %179 = vector.load %arg11[%c0_54, %c0_55] : memref<4x256xf32, #tpu.memory_space<vmem>>, vector<4x256xf32>
    %180 = vector.extract_strided_slice %179 {offsets = [0, 0], sizes = [1, 256], strides = [1, 1]} : vector<4x256xf32> to vector<1x256xf32>
    %181 = vector.extract_strided_slice %179 {offsets = [1, 0], sizes = [1, 256], strides = [1, 1]} : vector<4x256xf32> to vector<1x256xf32>
    %182 = vector.extract_strided_slice %179 {offsets = [2, 0], sizes = [1, 256], strides = [1, 1]} : vector<4x256xf32> to vector<1x256xf32>
    %183 = vector.extract_strided_slice %179 {offsets = [3, 0], sizes = [1, 256], strides = [1, 1]} : vector<4x256xf32> to vector<1x256xf32>
    %c0_56 = arith.constant 0 : index
    %c0_57 = arith.constant 0 : index
    %184 = vector.load %arg9[%c0_56, %c0_57] : memref<256x256xbf16, #tpu.memory_space<vmem>>, vector<256x256xbf16>
    %185 = arith.truncf %178 : vector<8x256xf32> to vector<8x256xbf16>
    %cst_58 = arith.constant dense<0.000000e+00> : vector<8x256xf32>
    %186 = tpu.matmul %185, %184, %cst_58 {dimension_numbers = #tpu.dot_dimension_numbers<[1], [0], [0], [1], [0, 0, 1, 1], [], []>} : vector<8x256xbf16>, vector<256x256xbf16>, vector<8x256xf32> -> vector<8x256xf32>
    %187 = vector.broadcast %180 : vector<1x256xf32> to vector<8x256xf32>
    %188 = arith.addf %186, %187 : vector<8x256xf32>
    %cst_59 = arith.constant dense<0.000000e+00> : vector<8xf32>
    %189 = vector.multi_reduction <add>, %188, %cst_59 [1] : vector<8x256xf32> to vector<8xf32>
    %190 = vector.shape_cast %189 : vector<8xf32> to vector<8x1xf32>
    %cst_60 = arith.constant 2.560000e+02 : f32
    %191 = vector.broadcast %cst_60 : f32 to vector<8x1xf32>
    %192 = arith.divf %190, %191 : vector<8x1xf32>
    %193 = vector.broadcast %192 : vector<8x1xf32> to vector<8x256xf32>
    %194 = arith.subf %188, %193 : vector<8x256xf32>
    %195 = arith.mulf %194, %194 : vector<8x256xf32>
    %cst_61 = arith.constant dense<0.000000e+00> : vector<8xf32>
    %196 = vector.multi_reduction <add>, %195, %cst_61 [1] : vector<8x256xf32> to vector<8xf32>
    %197 = vector.shape_cast %196 : vector<8xf32> to vector<8x1xf32>
    %cst_62 = arith.constant 2.560000e+02 : f32
    %198 = vector.broadcast %cst_62 : f32 to vector<8x1xf32>
    %199 = arith.divf %197, %198 : vector<8x1xf32>
    %200 = vector.broadcast %192 : vector<8x1xf32> to vector<8x256xf32>
    %201 = arith.subf %188, %200 : vector<8x256xf32>
    %cst_63 = arith.constant 9.99999974E-6 : f32
    %202 = vector.broadcast %cst_63 : f32 to vector<8x1xf32>
    %203 = arith.addf %199, %202 : vector<8x1xf32>
    %204 = math.rsqrt %203 : vector<8x1xf32>
    %205 = vector.broadcast %204 : vector<8x1xf32> to vector<8x256xf32>
    %206 = arith.mulf %201, %205 : vector<8x256xf32>
    %207 = vector.broadcast %181 : vector<1x256xf32> to vector<8x256xf32>
    %208 = arith.mulf %206, %207 : vector<8x256xf32>
    %209 = vector.broadcast %182 : vector<1x256xf32> to vector<8x256xf32>
    %210 = arith.addf %208, %209 : vector<8x256xf32>
    %cst_64 = arith.constant 0.000000e+00 : f32
    %211 = vector.broadcast %cst_64 : f32 to vector<8x256xf32>
    %212 = arith.maximumf %210, %211 : vector<8x256xf32>
    %c0_65 = arith.constant 0 : index
    %c0_66 = arith.constant 0 : index
    %213 = vector.load %arg10[%c0_65, %c0_66] : memref<256x256xbf16, #tpu.memory_space<vmem>>, vector<256x256xbf16>
    %214 = arith.truncf %212 : vector<8x256xf32> to vector<8x256xbf16>
    %cst_67 = arith.constant dense<0.000000e+00> : vector<8x256xf32>
    %215 = tpu.matmul %214, %213, %cst_67 {dimension_numbers = #tpu.dot_dimension_numbers<[1], [0], [0], [1], [0, 0, 1, 1], [], []>} : vector<8x256xbf16>, vector<256x256xbf16>, vector<8x256xf32> -> vector<8x256xf32>
    %216 = vector.broadcast %183 : vector<1x256xf32> to vector<8x256xf32>
    %217 = arith.addf %215, %216 : vector<8x256xf32>
    %c0_68 = arith.constant 0 : index
    %c0_69 = arith.constant 0 : index
    %218 = vector.load %arg12[%c0_68, %c0_69] : memref<8x256xf32, #tpu.memory_space<vmem>>, vector<8x256xf32>
    tpu.vector_store %arg12[%c0_68, %c0_69], %217 {strides = array<i32>} : memref<8x256xf32, #tpu.memory_space<vmem>>, vector<8x256xf32>,
    return
  }
  func.func @transform_0(%arg0: i32) -> (i32, i32) {
    %c0_i32 = arith.constant 0 : i32
    %c0_i32_0 = arith.constant 0 : i32
    return %arg0, %c0_i32 : i32, i32
  }
  func.func @transform_1(%arg0: i32) -> (i32, i32) {
    %c0_i32 = arith.constant 0 : i32
    %c0_i32_0 = arith.constant 0 : i32
    return %arg0, %c0_i32 : i32, i32
  }
  func.func @transform_2(%arg0: i32) -> (i32, i32) {
    %c0_i32 = arith.constant 0 : i32
    %c0_i32_0 = arith.constant 0 : i32
    return %arg0, %c0_i32 : i32, i32
  }
  func.func @transform_3(%arg0: i32) -> (i32, i32) {
    %c0_i32 = arith.constant 0 : i32
    %c0_i32_0 = arith.constant 0 : i32
    return %arg0, %c0_i32 : i32, i32
  }
  func.func @transform_4(%arg0: i32) -> (i32, i32) {
    %c0_i32 = arith.constant 0 : i32
    %c0_i32_0 = arith.constant 0 : i32
    return %arg0, %c0_i32 : i32, i32
  }
  func.func @transform_5(%arg0: i32) -> (i32, i32, i32) {
    %c0_i32 = arith.constant 0 : i32
    %c0_i32_0 = arith.constant 0 : i32
    %c0_i32_1 = arith.constant 0 : i32
    %c0_i32_2 = arith.constant 0 : i32
    return %c0_i32, %c0_i32_0, %c0_i32_1 : i32, i32, i32
  }
  func.func @transform_6(%arg0: i32) -> (i32, i32) {
    %c0_i32 = arith.constant 0 : i32
    %c0_i32_0 = arith.constant 0 : i32
    %c0_i32_1 = arith.constant 0 : i32
    return %c0_i32, %c0_i32_0 : i32, i32
  }
  func.func @transform_7(%arg0: i32) -> (i32, i32) {
    %c0_i32 = arith.constant 0 : i32
    %c0_i32_0 = arith.constant 0 : i32
    %c0_i32_1 = arith.constant 0 : i32
    return %c0_i32, %c0_i32_0 : i32, i32
  }
  func.func @transform_8(%arg0: i32) -> (i32, i32) {
    %c0_i32 = arith.constant 0 : i32
    %c0_i32_0 = arith.constant 0 : i32
    %c0_i32_1 = arith.constant 0 : i32
    return %c0_i32, %c0_i32_0 : i32, i32
  }
  func.func @transform_9(%arg0: i32) -> (i32, i32) {
    %c0_i32 = arith.constant 0 : i32
    %c0_i32_0 = arith.constant 0 : i32
    %c0_i32_1 = arith.constant 0 : i32
    return %c0_i32, %c0_i32_0 : i32, i32
  }
  func.func @transform_10(%arg0: i32) -> (i32, i32) {
    %c0_i32 = arith.constant 0 : i32
    %c0_i32_0 = arith.constant 0 : i32
    %c0_i32_1 = arith.constant 0 : i32
    return %c0_i32, %c0_i32_0 : i32, i32
  }
  func.func @transform_11(%arg0: i32) -> (i32, i32) {
    %c0_i32 = arith.constant 0 : i32
    %c0_i32_0 = arith.constant 0 : i32
    return %arg0, %c0_i32 : i32, i32
  }
}

</mosaic_0001>

<bundles_post_ra>
// kernel: tpu_custom_call.1
= control target key start
LH: loop header
LB: loop body
LE: loop exit
PB: predicated region body
PF: predicated region fallthrough
CT: control target
= control target key end

     0   :  { %16 = vsyncpa [#allocation3], 0  ;;  %s2951_s0 = inlined_call_operand.hbm [shape: f32[8,128], index: 0, kind: input, shape index: {}]   ;;  %s2952_s1 = inlined_call_operand.hbm [shape: f32[8,128], index: 1, kind: input, shape index: {}]   ;;  %s2953_s2 = inlined_call_operand.hbm [shape: f32[8,128], index: 2, kind: input, shape index: {}]   ;;  %s2954_s3 = inlined_call_operand.hbm [shape: f32[8,128], index: 3, kind: input, shape index: {}]   ;;  %s2955_s4 = inlined_call_operand.hbm [shape: f32[8,8], index: 4, kind: input, shape index: {}]   ;;  %s2956_s5 = inlined_call_operand.hbm [shape: bf16[7,128,128], index: 5, kind: input, shape index: {}]   ;;  %s2957_s6 = inlined_call_operand.hbm [shape: f32[13,128], index: 6, kind: input, shape index: {}]   ;;  %s2958_s7 = inlined_call_operand.hbm [shape: bf16[256,128], index: 7, kind: input, shape index: {}]   ;;  %s2959_s8 = inlined_call_operand.hbm [shape: bf16[256,256], index: 8, kind: input, shape index: {}]   ;;  %s2960_s9 = inlined_call_operand.hbm [shape: bf16[256,256], index: 9, kind: input, shape index: {}]   ;;  %s2961_s10 = inlined_call_operand.vmem [shape: f32[4,256], index: 10, kind: input, shape index: {}]   ;;  %s2962_s11 = inlined_call_operand.hbm [shape: f32[8,256], index: 11, kind: output, shape index: {}]  }
   0x1   :  { %17 = vsyncpa [#allocation6], 0 }
   0x2   :  { %18 = vsyncpa [#allocation9], 0 }
   0x3   :  { %19 = vsyncpa [#allocation12], 0 }
   0x4   :  { %20 = vsyncpa [#allocation15], 0 }
   0x5   :  { %21 = vsyncpa [#allocation18], 0 }
   0x6   :  { %22 = vsyncpa [#allocation4], 0  ;;  %s2637_s17 = smov [#allocation5]   ;;  %s2638_s19 = smov [#allocation8]  }
   0x7   :  { %s39_s18 = sshll.u32 %s2637_s17, 4  ;;  %s59_s20 = sshll.u32 %s2638_s19, 4  ;;  %s40_s18 = int_to_ptr.vmem [resolvable:$true] %s39_s18  ;;  %s60_s20 = int_to_ptr.vmem [resolvable:$true] %s59_s20 }
   0x8   :  { %s2411_s21 = scalar_lea.vmem %s40_s18, 128  ;;  %p2416_p1 = scmp.lt.s32.totalorder %s40_s18, %s40_s18 }
   0x9   :  { %p2412_p0 = scmp.ne.s32.totalorder %s40_s18, %s2411_s21  ;;  %p2417_p2 = scmp.lt.s32.totalorder %s2411_s21, %s2411_s21 }
   0xb   :  { %p2418_p3 = por %p2417_p2, %p2416_p1 }
   0xd   :  { %p2419_p4 = pnand %p2418_p3, %p2412_p0 }
   0xf   :  { %2422 = shalt.err (!%p2419_p4)
}
  0x10   :  { %42 = dma.hbm_to_vmem [thread:$0]  %s2952_s1, 128, %s40_s18, [#allocation6]  }
  0x11   :  { %s2431_s24 = scalar_lea.vmem %s60_s20, 128  ;;  %p2436_p6 = scmp.lt.s32.totalorder %s60_s20, %s60_s20 }
  0x12   :  { %p2432_p5 = scmp.ne.s32.totalorder %s60_s20, %s2431_s24  ;;  %p2437_p7 = scmp.lt.s32.totalorder %s2431_s24, %s2431_s24 }
  0x14   :  { %p2438_p8 = por %p2437_p7, %p2436_p6 }
  0x16   :  { %p2439_p9 = pnand %p2438_p8, %p2432_p5 }
  0x18   :  { %2442 = shalt.err (!%p2439_p9)
}
  0x19   :  { %62 = dma.hbm_to_vmem [thread:$0]  %s2954_s3, 128, %s60_s20, [#allocation9]  }
  0x1a   :  { %s2639_s27 = smov [#allocation11]  }
  0x1b   :  { %s78_s28 = sshll.u32 %s2639_s27, 4  ;;  %s79_s28 = int_to_ptr.vmem [resolvable:$true] %s78_s28 }
  0x1c   :  { %s2451_s29 = scalar_lea.vmem %s79_s28, 7168  ;;  %p2456_p11 = scmp.lt.s32.totalorder %s79_s28, %s79_s28 }
  0x1d   :  { %p2452_p10 = scmp.ne.s32.totalorder %s79_s28, %s2451_s29  ;;  %p2457_p12 = scmp.lt.s32.totalorder %s2451_s29, %s2451_s29 }
  0x1f   :  { %p2458_p13 = por %p2457_p12, %p2456_p11 }
  0x21   :  { %p2459_p0 = pnand %p2458_p13, %p2452_p10 }
  0x23   :  { %2462 = shalt.err (!%p2459_p0)
}
  0x24   :  { %s2640_s1 = smov 64   ;;  %s2641_s30 = smov 4  }
  0x25   :  { %84 = dma.hbm_to_vmem [thread:$0]  %s2956_s5, 7168, %s79_s28, [#allocation12], %s2640_s1, %s2640_s1, %s2641_s30  }
  0x26   :  { %s2642_s14 = smov [#allocation14]   ;;  %s2643_s3 = smov [#allocation2]  }
  0x27   :  { %s102_s15 = sshll.u32 %s2642_s14, 4  ;;  %s29_s16 = sshll.u32 %s2643_s3, 4  ;;  %s103_s15 = int_to_ptr.vmem [resolvable:$true] %s102_s15  ;;  %s30_s16 = int_to_ptr.vmem [resolvable:$true] %s29_s16 }
  0x28   :  { %s2471_s17 = scalar_lea.vmem %s103_s15, 2048  ;;  %p2476_p2 = scmp.lt.s32.totalorder %s103_s15, %s103_s15 }
  0x29   :  { %p2472_p1 = scmp.ne.s32.totalorder %s103_s15, %s2471_s17  ;;  %p2477_p3 = scmp.lt.s32.totalorder %s2471_s17, %s2471_s17 }
  0x2b   :  { %p2478_p4 = por %p2477_p3, %p2476_p2 }
  0x2d   :  { %p2479_p5 = pnand %p2478_p4, %p2472_p1 }
  0x2f   :  { %2482 = shalt.err (!%p2479_p5)
}
  0x30   :  { %108 = dma.hbm_to_vmem [thread:$0]  %s2958_s7, 2048, %s103_s15, [#allocation15], %s2640_s1, %s2640_s1, %s2641_s30  }
  0x31   :  { %s2491_s20 = scalar_lea.vmem %s30_s16, 128  ;;  %p2496_p7 = scmp.lt.s32.totalorder %s30_s16, %s30_s16 }
  0x32   :  { %p2492_p6 = scmp.ne.s32.totalorder %s30_s16, %s2491_s20  ;;  %p2497_p8 = scmp.lt.s32.totalorder %s2491_s20, %s2491_s20 }
  0x34   :  { %p2498_p9 = por %p2497_p8, %p2496_p7 }
  0x36   :  { %p2499_p10 = pnand %p2498_p9, %p2492_p6 }
  0x38   :  { %2502 = shalt.err (!%p2499_p10)
}
  0x39   :  { %32 = dma.hbm_to_vmem [thread:$0]  %s2951_s0, 128, %s30_s16, [#allocation3]  }
  0x3a   :  { %s2644_s22 = smov [#allocation7]   ;;  %s2645_s24 = smov [#allocation10]  }
  0x3b   :  { %s49_s23 = sshll.u32 %s2644_s22, 4  ;;  %s69_s25 = sshll.u32 %s2645_s24, 4  ;;  %s50_s23 = int_to_ptr.vmem [resolvable:$true] %s49_s23  ;;  %s70_s25 = int_to_ptr.vmem [resolvable:$true] %s69_s25 }
  0x3c   :  { %s2511_s26 = scalar_lea.vmem %s50_s23, 128  ;;  %p2516_p12 = scmp.lt.s32.totalorder %s50_s23, %s50_s23 }
  0x3d   :  { %p2512_p11 = scmp.ne.s32.totalorder %s50_s23, %s2511_s26  ;;  %p2517_p13 = scmp.lt.s32.totalorder %s2511_s26, %s2511_s26 }
  0x3f   :  { %p2518_p0 = por %p2517_p13, %p2516_p12 }
  0x41   :  { %p2519_p1 = pnand %p2518_p0, %p2512_p11 }
  0x43   :  { %2522 = shalt.err (!%p2519_p1)
}
  0x44   :  { %52 = dma.hbm_to_vmem [thread:$0]  %s2953_s2, 128, %s50_s23, [#allocation6]  }
  0x45   :  { %s2531_s28 = scalar_lea.vmem %s70_s25, 128  ;;  %p2536_p3 = scmp.lt.s32.totalorder %s70_s25, %s70_s25 }
  0x46   :  { %p2532_p2 = scmp.ne.s32.totalorder %s70_s25, %s2531_s28  ;;  %p2537_p4 = scmp.lt.s32.totalorder %s2531_s28, %s2531_s28 }
  0x48   :  { %p2538_p5 = por %p2537_p4, %p2536_p3 }
  0x4a   :  { %p2539_p6 = pnand %p2538_p5, %p2532_p2 }
  0x4c   :  { %2542 = shalt.err (!%p2539_p6)
}
  0x4d   :  { %72 = dma.hbm_to_vmem [thread:$0]  %s2955_s4, 128, %s70_s25, [#allocation9]  }
  0x4e   :  { %s2646_s1 = smov [#allocation13]  }
  0x4f   :  { %s90_s30 = sshll.u32 %s2646_s1, 4  ;;  %s91_s30 = int_to_ptr.vmem [resolvable:$true] %s90_s30 }
  0x50   :  { %s2551_s12 = scalar_lea.vmem %s91_s30, 256  ;;  %p2556_p8 = scmp.lt.s32.totalorder %s91_s30, %s91_s30 }
  0x51   :  { %p2552_p7 = scmp.ne.s32.totalorder %s91_s30, %s2551_s12  ;;  %p2557_p9 = scmp.lt.s32.totalorder %s2551_s12, %s2551_s12 }
  0x53   :  { %p2558_p10 = por %p2557_p9, %p2556_p8 }
  0x55   :  { %p2559_p11 = pnand %p2558_p10, %p2552_p7 }
  0x57   :  { %2562 = shalt.err (!%p2559_p11)
}
  0x58   :  { %s2647_s2 = smov 128   ;;  %s2648_s13 = smov 8  }
  0x59   :  { %96 = dma.hbm_to_vmem [thread:$0]  %s2957_s6, 256, %s91_s30, [#allocation12], %s2647_s2, %s2647_s2, %s2648_s13  }
  0x5a   :  { %s2649_s3 = smov [#allocation16]   ;;  %s2650_s17 = smov [#allocation17]  }
  0x5b   :  { %s114_s16 = sshll.u32 %s2649_s3, 4  ;;  %s126_s4 = sshll.u32 %s2650_s17, 4  ;;  %s115_s16 = int_to_ptr.vmem [resolvable:$true] %s114_s16  ;;  %s127_s4 = int_to_ptr.vmem [resolvable:$true] %s126_s4 }
  0x5c   :  { %s2571_s18 = scalar_lea.vmem %s115_s16, 4096  ;;  %p2576_p13 = scmp.lt.s32.totalorder %s115_s16, %s115_s16 }
  0x5d   :  { %p2572_p12 = scmp.ne.s32.totalorder %s115_s16, %s2571_s18  ;;  %p2577_p0 = scmp.lt.s32.totalorder %s2571_s18, %s2571_s18 }
  0x5f   :  { %p2578_p1 = por %p2577_p0, %p2576_p13 }
  0x61   :  { %p2579_p2 = pnand %p2578_p1, %p2572_p12 }
  0x63   :  { %2582 = shalt.err (!%p2579_p2)
}
  0x64   :  { %120 = dma.hbm_to_vmem [thread:$0]  %s2959_s8, 4096, %s115_s16, [#allocation15], %s2647_s2, %s2647_s2, %s2648_s13  }
  0x65   :  { %s2591_s5 = scalar_lea.vmem %s127_s4, 4096  ;;  %p2596_p4 = scmp.lt.s32.totalorder %s127_s4, %s127_s4 }
  0x66   :  { %p2592_p3 = scmp.ne.s32.totalorder %s127_s4, %s2591_s5  ;;  %p2597_p5 = scmp.lt.s32.totalorder %s2591_s5, %s2591_s5 }
  0x68   :  { %p2598_p6 = por %p2597_p5, %p2596_p4 }
  0x6a   :  { %p2599_p7 = pnand %p2598_p6, %p2592_p3 }
  0x6c   :  { %2602 = shalt.err (!%p2599_p7)
}
  0x6d   :  { %132 = dma.hbm_to_vmem [thread:$0]  %s2960_s9, 4096, %s127_s4, [#allocation18], %s2647_s2, %s2647_s2, %s2648_s13  }
  0x6e   :  { %2623 = dma.done.wait [#allocation3], 128  }
  0x6f   :  { %2624 = vsyncadd [#allocation3], 4294967168 }
  0x70   :  { %2625 = dma.done.wait [#allocation6], 256  }
  0x71   :  { %2626 = vsyncadd [#allocation6], 4294967040 }
  0x72   :  { %2627 = dma.done.wait [#allocation9], 256  }
  0x73   :  { %2628 = vsyncadd [#allocation9], 4294967040 }
  0x74   :  { %2629 = dma.done.wait [#allocation12], 7424  }
  0x75   :  { %2630 = vsyncadd [#allocation12], 4294959872 }
  0x76   :  { %2631 = dma.done.wait [#allocation15], 6144  }
  0x77   :  { %2632 = vsyncadd [#allocation15], 4294961152 }
  0x78   :  { %2633 = dma.done.wait [#allocation18], 4096  }
  0x79   :  { %2634 = vsyncadd [#allocation18], 4294963200  ;;  %v2651_v0 = vmov 1   ;;  %v2652_v1 = vmov 0   ;;  %v2653_v2 = vmov 0.0   ;;  %v2753_v3 = vld [vmem:[#allocation10] sm:$0xff]  ;;  %v317_v37 = vlaneseq }
  0x7a   :  { %2215 = vset.pattern.permute.xlu0 %v2651_v0  ;;  %2216 = vset.pattern.permute.xlu1 %v2652_v1  ;;  %v2757_v4 = vsub.f32 1.0, %v2753_v3  ;;  %v2224_v5 = vld [vmem:[#allocation11 + $0x38] sm:$0xff]   ;;  %v2225_v6 = vld [vmem:[#allocation11 + $0x30] sm:$0xff]   ;;  %vm2654_vm0 = vmmov 0   ;;  %v2226_v7 = vld [vmem:[#allocation11 + $0x28] sm:$0xff]  }
  0x7b   :  { %2051 = vmatprep.subr.bf16.mxu0 %v2653_v2  ;;  %2071 = vmatprep.subr.bf16.mxu1 %v2653_v2  ;;  %v2227_v8 = vld [vmem:[#allocation11 + $0x20] sm:$0xff]   ;;  %v2228_v9 = vld [vmem:[#allocation11 + $0x18] sm:$0xff]   ;;  %v2229_v10 = vld [vmem:[#allocation11 + $0x10] sm:$0xff]   ;;  %v2794_v38 = vshrl.u32 %v317_v37, 7 }
  0x7c   :  { %186 = vperm.xlu0 %2215, %v2753_v3   ;;  %173 = vperm.xlu1 %2216, %v2753_v3   ;;  %v2230_v11 = vld [vmem:[#allocation11 + $0x8] sm:$0xff]   ;;  %v2231_v12 = vld [vmem:[#allocation11] sm:$0xff]   ;;  %v166_v15 = vld [vmem:[#allocation2] sm:$0xff] }
  0x7d   :  { %2052 = vmatpush3.bf16.msra.mxu0 %v2224_v5  ;;  %2067 = vmatprep.mubr.msk.bf16.mxu0 %vm2654_vm0, %v2653_v2  ;;  %v168_v14 = vld [vmem:[#allocation7] sm:$0xff]  ;;  %v2232_v20 = vld [vmem:[#allocation11 + $0xb8] sm:$0xff]   ;;  %v2233_v22 = vld [vmem:[#allocation11 + $0xb0] sm:$0xff]   ;;  %v2797_v39 = vsub.s32 0, %v2794_v38  ;;  %v2804_v47 = vsub.s32 4, %v2794_v38 }
  0x7e   :  { %2053 = vmatprep.subr.bf16.mxu0 %v2653_v2  ;;  %2087 = vmatprep.mubr.msk.bf16.mxu1 %vm2654_vm0, %v2653_v2  ;;  %v2234_v23 = vld [vmem:[#allocation11 + $0xa8] sm:$0xff]   ;;  %v2235_v24 = vld [vmem:[#allocation11 + $0xa0] sm:$0xff]   ;;  %v2236_v26 = vld [vmem:[#allocation11 + $0x98] sm:$0xff]  }
  0x7f   :  { %v2237_v27 = vld [vmem:[#allocation11 + $0x90] sm:$0xff]   ;;  %v167_v30 = vld [vmem:[#allocation5] sm:$0xff]  ;;  %v2238_v31 = vld [vmem:[#allocation11 + $0x88] sm:$0xff]  }
  0x80   :  { %191 = vperm.xlu0 %2215, %v2757_v4   ;;  %180 = vperm.xlu1 %2216, %v2757_v4   ;;  %v169_v28 = vld [vmem:[#allocation8] sm:$0xff]  ;;  %v2239_v34 = vld [vmem:[#allocation11 + $0x80] sm:$0xff]   ;;  %v2240_v54 = vld [vmem:[#allocation11 + $0x78] sm:$0xff]  }
  0x81   :  { %2054 = vmatpush3.bf16.msra.mxu0 %v2225_v6  ;;  %v2799_v40 = vld [vmem:[#allocation13] sm:$0xff]  ;;  %2072 = vmatpush3.bf16.msra.mxu1 %v2240_v54  ;;  %v2241_v59 = vld [vmem:[#allocation11 + $0x70] sm:$0xff]   ;;  %v2242_v60 = vld [vmem:[#allocation11 + $0x68] sm:$0xff]  }
  0x82   :  { %2055 = vmatprep.subr.bf16.mxu0 %v2653_v2  ;;  %v320_v41 = vrot.slane %v2799_v40, %v2797_v39  ;;  %v535_v48 = vrot.slane %v2799_v40, %v2804_v47  ;;  %2073 = vmatprep.subr.bf16.mxu1 %v2653_v2  ;;  %v2243_v61 = vld [vmem:[#allocation11 + $0x60] sm:$0xff]   ;;  %v2244_v62 = vld [vmem:[#allocation11 + $0x58] sm:$0xff]   ;;  %v2245_v63 = vld [vmem:[#allocation11 + $0x50] sm:$0xff]  }
  0x83   :  { %v2246_v5 = vld [vmem:[#allocation11 + $0x48] sm:$0xff]   ;;  %v2260_v54 = vld [vmem:[#allocation11 + $0x118] sm:$0xff]  }
  0x85   :  { %2056 = vmatpush3.bf16.msra.mxu0 %v2226_v7  ;;  %2074 = vmatpush3.bf16.msra.mxu1 %v2241_v59  ;;  %v2265_v59 = vld [vmem:[#allocation11 + $0x170] sm:$0xff]  }
  0x86   :  { %2057 = vmatprep.subr.bf16.mxu0 %v2653_v2  ;;  %2075 = vmatprep.subr.bf16.mxu1 %v2653_v2 }
  0x89   :  { %2058 = vmatpush3.bf16.msra.mxu0 %v2227_v8  ;;  %2076 = vmatpush3.bf16.msra.mxu1 %v2242_v60  ;;  %v2247_v8 = vld [vmem:[#allocation11 + $0x40] sm:$0xff]   ;;  %v2266_v60 = vld [vmem:[#allocation11 + $0x168] sm:$0xff]  }
  0x8a   :  { %2059 = vmatprep.subr.bf16.mxu0 %v2653_v2  ;;  %2077 = vmatprep.subr.bf16.mxu1 %v2653_v2 }
  0x8d   :  { %2060 = vmatpush3.bf16.msra.mxu0 %v2228_v9  ;;  %2078 = vmatpush3.bf16.msra.mxu1 %v2243_v61  ;;  %v2655_v9 = vmov 2   ;;  %v2267_v61 = vld [vmem:[#allocation11 + $0x160] sm:$0xff]  }
  0x8e   :  { %2061 = vmatprep.subr.bf16.mxu0 %v2653_v2  ;;  %2079 = vmatprep.subr.bf16.mxu1 %v2653_v2 }
  0x8f   :  { %2217 = vset.pattern.permute.xlu1 %v2655_v9  ;;  %v649_v9 = vsub.s32 7, %v2794_v38 }
  0x91   :  { %2062 = vmatpush3.bf16.msra.mxu0 %v2229_v10  ;;  %2080 = vmatpush3.bf16.msra.mxu1 %v2244_v62  ;;  %v2656_v10 = vmov 3   ;;  %v2268_v62 = vld [vmem:[#allocation11 + $0x158] sm:$0xff]  }
  0x92   :  { %2063 = vmatprep.subr.bf16.mxu0 %v2653_v2  ;;  %2081 = vmatprep.subr.bf16.mxu1 %v2653_v2 }
  0x93   :  { %2218 = vset.pattern.permute.xlu0 %v2656_v10 }
  0x95   :  { %2064 = vmatpush3.bf16.msra.mxu0 %v2230_v11  ;;  %2082 = vmatpush3.bf16.msra.mxu1 %v2245_v63  ;;  %v2269_v63 = vld [vmem:[#allocation11 + $0x150] sm:$0xff]  }
  0x96   :  { %2065 = vmatprep.subr.bf16.mxu0 %v2653_v2  ;;  %2083 = vmatprep.subr.bf16.mxu1 %v2653_v2 }
  0x99   :  { %2066 = vmatpush3.bf16.msra.mxu0 %v2231_v12  ;;  %2084 = vmatpush3.bf16.msra.mxu1 %v2246_v5 }
  0x9a   :  { %2091 = vmatprep.subr.bf16.mxu0 %v2653_v2  ;;  %2085 = vmatprep.subr.bf16.mxu1 %v2653_v2 }
  0x9d   :  { %2086 = vmatpush3.bf16.msra.mxu1 %v2247_v8 }
  0x9e   :  { %2111 = vmatprep.subr.bf16.mxu1 %v2653_v2 }
  0xf7   :  { %v187_v13 = vpop.permute.xlu0 %186  ;;  %v174_v25 = vpop.permute.xlu1 %173 }
  0xf8   :  { %v189_v17 = vmul.f32 %v187_v13, %v168_v14  ;;  %v176_v32 = vmul.f32 %v174_v25, %v169_v28  ;;  %v2820_v14 = vsub.s32 1, %v2794_v38  ;;  %v2249_v25 = vld [vmem:[#allocation11 + $0xf0] sm:$0xff]   ;;  %v2250_v28 = vld [vmem:[#allocation11 + $0xe8] sm:$0xff]  }
  0xfb   :  { %v192_v16 = vpop.permute.xlu0 %191  ;;  %v181_v29 = vpop.permute.xlu1 %180 }
  0xfc   :  { %v194_v18 = vmul.f32 %v192_v16, %v166_v15  ;;  %v183_v33 = vmul.f32 %v181_v29, %v167_v30  ;;  %v2823_v15 = vsub.s32 2, %v2794_v38  ;;  %v424_v16 = vrot.slane %v2799_v40, %v2820_v14  ;;  %v2251_v30 = vld [vmem:[#allocation11 + $0xe0] sm:$0xff]  }
  0xfe   :  { %v2774_v19 = vadd.f32 %v194_v18, %v189_v17  ;;  %v2786_v35 = vadd.f32 %v183_v33, %v176_v32  ;;  %v637_v32 = vsub.s32 5, %v2794_v38  ;;  %v2253_v33 = vld [vmem:[#allocation11 + $0xd0] sm:$0xff]  }
 0x100   :  { %v316_v21 = vpack.c.bf16 %v2774_v19, %v2774_v19  ;;  %v531_v36 = vpack.c.bf16 %v2786_v35, %v2786_v35 }
 0x102   :  { %2068 = vmatmul.mubr.bf16.vlgmr.msra.gmra.mxu0 %v316_v21 }
 0x103   :  { %2092 = vmatpush3.bf16.msra.mxu0 %v2232_v20  ;;  %2107 = vmatprep.mubr.msk.bf16.mxu0 %vm2654_vm0, %v2653_v2  ;;  %v429_v20 = vrot.slane %v2799_v40, %v2823_v15 }
 0x104   :  { %2093 = vmatprep.subr.bf16.mxu0 %v2653_v2 }
 0x107   :  { %2094 = vmatpush3.bf16.msra.mxu0 %v2233_v22 }
 0x108   :  { %2095 = vmatprep.subr.bf16.mxu0 %v2653_v2 }
 0x10b   :  { %2096 = vmatpush3.bf16.msra.mxu0 %v2234_v23  ;;  %v2248_v23 = vld [vmem:[#allocation11 + $0xf8] sm:$0xff]  }
 0x10c   :  { %2097 = vmatprep.subr.bf16.mxu0 %v2653_v2 }
 0x10f   :  { %2098 = vmatpush3.bf16.msra.mxu0 %v2235_v24 }
 0x110   :  { %2099 = vmatprep.subr.bf16.mxu0 %v2653_v2 }
 0x113   :  { %2100 = vmatpush3.bf16.msra.mxu0 %v2236_v26 }
 0x114   :  { %2101 = vmatprep.subr.bf16.mxu0 %v2653_v2 }
 0x117   :  { %2102 = vmatpush3.bf16.msra.mxu0 %v2237_v27 }
 0x118   :  { %2103 = vmatprep.subr.bf16.mxu0 %v2653_v2 }
 0x11b   :  { %2104 = vmatpush3.bf16.msra.mxu0 %v2238_v31  ;;  %v2252_v31 = vld [vmem:[#allocation11 + $0xd8] sm:$0xff]  }
 0x11c   :  { %2105 = vmatprep.subr.bf16.mxu0 %v2653_v2 }
 0x11f   :  { %2106 = vmatpush3.bf16.msra.mxu0 %v2239_v34  ;;  %v642_v34 = vsub.s32 6, %v2794_v38 }
 0x120   :  { %2131 = vmatprep.subr.bf16.mxu0 %v2653_v2 }
 0x122   :  { %2108 = vmatmul.mubr.bf16.vlgmr.msra.gmra.mxu0 %v531_v36  ;;  %v638_v36 = vrot.slane %v2799_v40, %v637_v32 }
 0x123   :  { %2147 = vmatprep.mubr.msk.bf16.mxu0 %vm2654_vm0, %v2653_v2 }
 0x1c2   :  { %v403_v42 = vpop.f32.mrf.mxu0 }
 0x1c3   :  { %v404_v43 = vadd.f32 %v403_v42, %v320_v41  ;;  %v2254_v41 = vld [vmem:[#allocation11 + $0xc8] sm:$0xff]  }
 0x1c4   :  { %v2069_v44 = vpop.f32.mrf.mxu0 }
 0x1c5   :  { %409 = vadd.xlane.f32.xlu0 %v404_v43 }
 0x1c6   :  { %v406_v45 = vpop.f32.mrf.mxu0 }
 0x1c7   :  { %v2255_v45 = vld [vmem:[#allocation11 + $0xc0] sm:$0xff]  }
 0x1c8   :  { %v2070_v46 = vpop.f32.mrf.mxu0 }
 0x1e2   :  { %v618_v49 = vpop.f32.mrf.mxu0 }
 0x1e3   :  { %v619_v50 = vadd.f32 %v618_v49, %v535_v48 }
 0x1e4   :  { %v2109_v51 = vpop.f32.mrf.mxu0 }
 0x1e5   :  { %624 = vadd.xlane.f32.xlu1 %v619_v50  ;;  %v2257_v51 = vld [vmem:[#allocation11 + $0x130] sm:$0xff]  }
 0x1e6   :  { %v621_v52 = vpop.f32.mrf.mxu0 }
 0x1e7   :  { %v2258_v52 = vld [vmem:[#allocation11 + $0x128] sm:$0xff]  }
 0x1e8   :  { %v2110_v53 = vpop.f32.mrf.mxu0 }
 0x1e9   :  { %v2259_v53 = vld [vmem:[#allocation11 + $0x120] sm:$0xff]  }
 0x1f6   :  { %526 = vperm.xlu1 %2217, %v2753_v3  }
 0x1fa   :  { %2219 = vset.pattern.permute.xlu1 %v2656_v10 }
 0x1fb   :  { %935 = vperm.xlu1 %2219, %v2757_v4  }
 0x24e   :  { %v410_v55 = vpop.xlane.xlu0 %409 }
 0x24f   :  { %v412_v56 = vmul.f32 0.0078125, %v410_v55  ;;  %v2261_v55 = vld [vmem:[#allocation11 + $0x110] sm:$0xff]  }
 0x251   :  { %v413_v57 = vsub.f32 %v404_v43, %v412_v56  ;;  %v643_v43 = vrot.slane %v2799_v40, %v642_v34  ;;  %v2262_v56 = vld [vmem:[#allocation11 + $0x108] sm:$0xff]  }
 0x253   :  { %v414_v58 = vmul.f32 %v413_v57, %v413_v57 }
 0x255   :  { %415 = vadd.xlane.f32.xlu0 %v414_v58  ;;  %v2264_v58 = vld [vmem:[#allocation11 + $0x178] sm:$0xff]  }
 0x26e   :  { %v625_v0 = vpop.xlane.xlu1 %624 }
 0x26f   :  { %v626_v1 = vmul.f32 0.0078125, %v625_v0 }
 0x271   :  { %v627_v6 = vsub.f32 %v619_v50, %v626_v1  ;;  %v2256_v50 = vld [vmem:[#allocation11 + $0x138] sm:$0xff]  }
 0x272   :  { %2132 = vmatpush3.bf16.msra.mxu0 %v2256_v50  ;;  %v2281_v50 = vld [vmem:[#allocation14 + $0x18] sm:$0xff]  }
 0x273   :  { %v628_v7 = vmul.f32 %v627_v6, %v627_v6  ;;  %2133 = vmatprep.subr.bf16.mxu0 %v2653_v2 }
 0x275   :  { %629 = vadd.xlane.f32.xlu0 %v628_v7  ;;  %v2863_v7 = vsub.s32 3, %v2794_v38 }
 0x276   :  { %2134 = vmatpush3.bf16.msra.mxu0 %v2257_v51  ;;  %v2282_v51 = vld [vmem:[#allocation14 + $0x50] sm:$0xff]  }
 0x277   :  { %2135 = vmatprep.subr.bf16.mxu0 %v2653_v2  ;;  %v436_v8 = vrot.slane %v2799_v40, %v2863_v7 }
 0x27a   :  { %2136 = vmatpush3.bf16.msra.mxu0 %v2258_v52  ;;  %v2283_v52 = vld [vmem:[#allocation14 + $0x10] sm:$0xff]  }
 0x27b   :  { %2137 = vmatprep.subr.bf16.mxu0 %v2653_v2 }
 0x27e   :  { %2138 = vmatpush3.bf16.msra.mxu0 %v2259_v53  ;;  %v2284_v53 = vld [vmem:[#allocation14 + $0x48] sm:$0xff]  }
 0x27f   :  { %2139 = vmatprep.subr.bf16.mxu0 %v2653_v2 }
 0x282   :  { %2140 = vmatpush3.bf16.msra.mxu0 %v2260_v54  ;;  %v2285_v54 = vld [vmem:[#allocation14 + $0x8] sm:$0xff]  }
 0x283   :  { %2141 = vmatprep.subr.bf16.mxu0 %v2653_v2 }
 0x286   :  { %2142 = vmatpush3.bf16.msra.mxu0 %v2261_v55  ;;  %v2286_v55 = vld [vmem:[#allocation14 + $0x40] sm:$0xff]  }
 0x287   :  { %2143 = vmatprep.subr.bf16.mxu0 %v2653_v2 }
 0x28a   :  { %2144 = vmatpush3.bf16.msra.mxu0 %v2262_v56  ;;  %v2287_v56 = vld [vmem:[#allocation14] sm:$0xff]  }
 0x28b   :  { %930 = vperm.xlu0 %2218, %v2753_v3   ;;  %2145 = vmatprep.subr.bf16.mxu0 %v2653_v2 }
 0x2de   :  { %v416_v11 = vpop.xlane.xlu0 %415 }
 0x2df   :  { %v417_v12 = vmul.f32 0.0078125, %v416_v11  ;;  %v650_v11 = vrot.slane %v2799_v40, %v649_v9  ;;  %v2271_v40 = vld [vmem:[#allocation11 + $0x140] sm:$0xff]  }
 0x2e1   :  { %v418_v13 = vadd.f32 1e-05, %v417_v12  ;;  %v527_v12 = vpop.permute.xlu1 %526 }
 0x2e3   :  { %2392 = vrsqrt.f32 %v418_v13 }
 0x2f0   :  { %v2393_v17 = vpop.eup %2392 }
 0x2f1   :  { %v420_v18 = vmul.f32 %v2393_v17, %v413_v57  ;;  %v2263_v57 = vld [vmem:[#allocation11 + $0x100] sm:$0xff]  }
 0x2f2   :  { %2146 = vmatpush3.bf16.msra.mxu0 %v2263_v57  ;;  %v2288_v57 = vld [vmem:[#allocation11 + $0x1b8] sm:$0xff]  }
 0x2f3   :  { %v425_v21 = vmul.f32 %v424_v16, %v420_v18 }
 0x2f5   :  { %v430_v4 = vadd.f32 %v429_v20, %v425_v21 }
 0x2f7   :  { %v431_v22 = vmax.f32 %v430_v4, 0.0 }
 0x2f9   :  { %v432_v24 = vpack.c.bf16 %v431_v22, %v431_v22 }
 0x2fb   :  { %2088 = vmatmul.mubr.bf16.vlgmr.msra.gmra.mxu1 %v432_v24 }
 0x2fc   :  { %2112 = vmatpush3.bf16.msra.mxu1 %v2248_v23  ;;  %2127 = vmatprep.mubr.msk.bf16.mxu1 %vm2654_vm0, %v2653_v2 }
 0x2fd   :  { %2113 = vmatprep.subr.bf16.mxu1 %v2653_v2 }
 0x2fe   :  { %v630_v26 = vpop.xlane.xlu0 %629 }
 0x2ff   :  { %v631_v27 = vmul.f32 0.0078125, %v630_v26  ;;  %v2272_v26 = vld [vmem:[#allocation14 + $0x78] sm:$0xff]  }
 0x300   :  { %2114 = vmatpush3.bf16.msra.mxu1 %v2249_v25  ;;  %v2270_v25 = vld [vmem:[#allocation11 + $0x148] sm:$0xff]   ;;  %2020 = vmatprep.subr.bf16.mxu0 %v2272_v26 }
 0x301   :  { %v632_v29 = vadd.f32 1e-05, %v631_v27  ;;  %2115 = vmatprep.subr.bf16.mxu1 %v2653_v2  ;;  %v2273_v27 = vld [vmem:[#allocation14 + $0x38] sm:$0xff]  }
 0x303   :  { %2394 = vrsqrt.f32 %v632_v29  ;;  %v2276_v29 = vld [vmem:[#allocation14 + $0x68] sm:$0xff]  }
 0x304   :  { %2116 = vmatpush3.bf16.msra.mxu1 %v2250_v28  ;;  %v2657_v28 = vmov 5  }
 0x305   :  { %2117 = vmatprep.subr.bf16.mxu1 %v2653_v2  ;;  %2220 = vset.pattern.permute.xlu1 %v2657_v28  ;;  %v2294_v28 = vld [vmem:[#allocation11 + $0x188] sm:$0xff]  }
 0x306   :  { %949 = vperm.xlu1 %2220, %v2753_v3  }
 0x308   :  { %2118 = vmatpush3.bf16.msra.mxu1 %v2251_v30  ;;  %v2658_v30 = vmov 4  }
 0x309   :  { %2119 = vmatprep.subr.bf16.mxu1 %v2653_v2 }
 0x30a   :  { %2221 = vset.pattern.permute.xlu1 %v2658_v30  ;;  %v2301_v30 = vld [vmem:[#allocation16 + $0x64] ss:$8 sps:$4 sm:$0xff]  }
 0x30b   :  { %944 = vperm.xlu1 %2221, %v2753_v3  }
 0x30c   :  { %2120 = vmatpush3.bf16.msra.mxu1 %v2252_v31  ;;  %v2277_v31 = vld [vmem:[#allocation14 + $0x28] sm:$0xff]  }
 0x30d   :  { %2121 = vmatprep.subr.bf16.mxu1 %v2653_v2 }
 0x310   :  { %v2395_v37 = vpop.eup %2394  ;;  %2122 = vmatpush3.bf16.msra.mxu1 %v2253_v33  ;;  %v2278_v33 = vld [vmem:[#allocation14 + $0x60] sm:$0xff]  }
 0x311   :  { %2123 = vmatprep.subr.bf16.mxu1 %v2653_v2  ;;  %v634_v42 = vmul.f32 %v2395_v37, %v627_v6  ;;  %v2883_v37 = vld [vmem:[#allocation13 + $0x8] sm:$0x1f] }
 0x313   :  { %v639_v44 = vmul.f32 %v638_v36, %v634_v42  ;;  %v2279_v36 = vld [vmem:[#allocation14 + $0x20] sm:$0xff]   ;;  %v745_v42 = vrot.slane %v2883_v37, %v2797_v39 }
 0x314   :  { %2124 = vmatpush3.bf16.msra.mxu1 %v2254_v41 }
 0x315   :  { %2125 = vmatprep.subr.bf16.mxu1 %v2653_v2  ;;  %v644_v46 = vadd.f32 %v643_v43, %v639_v44 }
 0x317   :  { %v645_v48 = vmax.f32 %v644_v46, 0.0 }
 0x318   :  { %2126 = vmatpush3.bf16.msra.mxu1 %v2255_v45 }
 0x319   :  { %v646_v49 = vpack.c.bf16 %v645_v48, %v645_v48  ;;  %2151 = vmatprep.subr.bf16.mxu1 %v2653_v2 }
 0x31b   :  { %2128 = vmatmul.mubr.bf16.vlgmr.msra.gmra.mxu1 %v646_v49  ;;  %v2280_v49 = vld [vmem:[#allocation14 + $0x58] sm:$0xff]  }
 0x31c   :  { %2167 = vmatprep.mubr.msk.bf16.mxu1 %vm2654_vm0, %v2653_v2  ;;  %2152 = vmatpush3.bf16.msra.mxu1 %v2264_v58  ;;  %v2659_v58 = vmov 6  }
 0x31d   :  { %2153 = vmatprep.subr.bf16.mxu1 %v2653_v2  ;;  %2222 = vset.pattern.permute.xlu1 %v2659_v58 }
 0x31e   :  { %2223 = vset.pattern.permute.xlu0 %v2659_v58 }
 0x320   :  { %2154 = vmatpush3.bf16.msra.mxu1 %v2265_v59  ;;  %v2402_v59 = vld [vmem:[#allocation10] sm:$0xff] }
 0x321   :  { %2155 = vmatprep.subr.bf16.mxu1 %v2653_v2  ;;  %988 = vperm.xlu1 %2222, %v2402_v59   ;;  %v2316_v59 = vld [vmem:[#allocation16 + $0x14] ss:$8 sps:$4 sm:$0xff]  }
 0x324   :  { %2156 = vmatpush3.bf16.msra.mxu1 %v2266_v60  ;;  %v2289_v60 = vld [vmem:[#allocation11 + $0x1b0] sm:$0xff]  }
 0x325   :  { %2157 = vmatprep.subr.bf16.mxu1 %v2653_v2 }
 0x328   :  { %2158 = vmatpush3.bf16.msra.mxu1 %v2267_v61  ;;  %v2290_v61 = vld [vmem:[#allocation11 + $0x1a8] sm:$0xff]  }
 0x329   :  { %2159 = vmatprep.subr.bf16.mxu1 %v2653_v2 }
 0x32c   :  { %2160 = vmatpush3.bf16.msra.mxu1 %v2268_v62  ;;  %v2291_v62 = vld [vmem:[#allocation11 + $0x1a0] sm:$0xff]  }
 0x32d   :  { %2161 = vmatprep.subr.bf16.mxu1 %v2653_v2 }
 0x330   :  { %2162 = vmatpush3.bf16.msra.mxu1 %v2269_v63  ;;  %v2292_v63 = vld [vmem:[#allocation11 + $0x198] sm:$0xff]  }
 0x331   :  { %2163 = vmatprep.subr.bf16.mxu1 %v2653_v2 }
 0x334   :  { %2164 = vmatpush3.bf16.msra.mxu1 %v2270_v25 }
 0x335   :  { %2165 = vmatprep.subr.bf16.mxu1 %v2653_v2 }
 0x338   :  { %2166 = vmatpush3.bf16.msra.mxu1 %v2271_v40 }
 0x339   :  { %2171 = vmatprep.subr.bf16.mxu1 %v2653_v2 }
 0x3bb   :  { %v519_v0 = vpop.f32.mrf.mxu1 }
 0x3bc   :  { %v520_v10 = vadd.f32 %v519_v0, %v436_v8  ;;  %v936_v0 = vpop.permute.xlu1 %935 }
 0x3bd   :  { %v2089_v1 = vpop.f32.mrf.mxu1 }
 0x3be   :  { %v529_v16 = vmul.f32 %v527_v12, %v520_v10  ;;  %v839_v1 = vrot.slane %v2883_v37, %v2820_v14 }
 0x3bf   :  { %v522_v5 = vpop.f32.mrf.mxu1 }
 0x3c0   :  { %v2872_v4 = vadd.f32 %v529_v16, %v2774_v19  ;;  %v2274_v19 = vld [vmem:[#allocation14 + $0x70] sm:$0xff]   ;;  %v950_v10 = vpop.permute.xlu1 %949 }
 0x3c1   :  { %v2090_v6 = vpop.f32.mrf.mxu1 }
 0x3c2   :  { %v931_v6 = vpop.permute.xlu0 %930 }
 0x3db   :  { %v733_v13 = vpop.f32.mrf.mxu1 }
 0x3dc   :  { %v734_v17 = vadd.f32 %v733_v13, %v650_v11  ;;  %v938_v13 = vmul.f32 %v936_v0, %v2872_v4 }
 0x3dd   :  { %v2129_v18 = vpop.f32.mrf.mxu1 }
 0x3de   :  { %v739_v20 = vmul.f32 %v734_v17, %v527_v12 }
 0x3df   :  { %v736_v21 = vpop.f32.mrf.mxu1 }
 0x3e0   :  { %v2875_v22 = vadd.f32 %v739_v20, %v2786_v35  ;;  %v2275_v35 = vld [vmem:[#allocation14 + $0x30] sm:$0xff]  }
 0x3e1   :  { %v2130_v23 = vpop.f32.mrf.mxu1 }
 0x3e2   :  { %v741_v24 = vpack.c.bf16 %v2872_v4, %v2875_v22  ;;  %v941_v23 = vmul.f32 %v936_v0, %v2875_v22  ;;  %v2293_v4 = vld [vmem:[#allocation11 + $0x190] sm:$0xff]   ;;  %v2295_v22 = vld [vmem:[#allocation11 + $0x180] sm:$0xff]  }
 0x3e3   :  { %v2320_v0 = vld [vmem:[#allocation16 + $0xf0] ss:$8 sps:$4 sm:$0xff]  }
 0x3e4   :  { %2148 = vmatmul.mubr.bf16.vlgmr.msra.gmra.mxu0 %v741_v24  ;;  %v945_v24 = vpop.permute.xlu1 %944 }
 0x3e5   :  { %2021 = vmatpush3.bf16.msra.mxu0 %v2273_v27 }
 0x3e6   :  { %2022 = vmatprep.subr.bf16.mxu0 %v2274_v19 }
 0x3e9   :  { %2023 = vmatpush3.bf16.msra.mxu0 %v2275_v35  ;;  %v2296_v35 = vld [vmem:[#allocation16 + $0x70] ss:$8 sps:$4 sm:$0xff]  }
 0x3ea   :  { %2024 = vmatprep.subr.bf16.mxu0 %v2276_v29  ;;  %v2298_v29 = vld [vmem:[#allocation16 + $0x74] ss:$8 sps:$4 sm:$0xff]  }
 0x3ed   :  { %2025 = vmatpush3.bf16.msra.mxu0 %v2277_v31  ;;  %v2299_v31 = vld [vmem:[#allocation16 + $0x60] ss:$8 sps:$4 sm:$0xff]  }
 0x3ee   :  { %2026 = vmatprep.subr.bf16.mxu0 %v2278_v33  ;;  %v2304_v33 = vld [vmem:[#allocation16 + $0x54] ss:$8 sps:$4 sm:$0xff]  }
 0x3f1   :  { %2027 = vmatpush3.bf16.msra.mxu0 %v2279_v36  ;;  %v2302_v36 = vld [vmem:[#allocation16 + $0x50] ss:$8 sps:$4 sm:$0xff]  }
 0x3f2   :  { %2028 = vmatprep.subr.bf16.mxu0 %v2280_v49 }
 0x3f5   :  { %2029 = vmatpush3.bf16.msra.mxu0 %v2281_v50 }
 0x3f6   :  { %2030 = vmatprep.subr.bf16.mxu0 %v2282_v51 }
 0x3f9   :  { %2031 = vmatpush3.bf16.msra.mxu0 %v2283_v52  ;;  %v1135_v52 = vrot.slane %v2883_v37, %v2863_v7 }
 0x3fa   :  { %2032 = vmatprep.subr.bf16.mxu0 %v2284_v53 }
 0x3fd   :  { %2033 = vmatpush3.bf16.msra.mxu0 %v2285_v54 }
 0x3fe   :  { %2034 = vmatprep.subr.bf16.mxu0 %v2286_v55 }
 0x401   :  { %2035 = vmatpush3.bf16.msra.mxu0 %v2287_v56 }
 0x402   :  { %1454 = vmatprep.subr.bf16.mxu0 %v2298_v29 }
 0x4a4   :  { %v828_v41 = vpop.f32.mrf.mxu0 }
 0x4a5   :  { %v829_v45 = vadd.f32 %v828_v41, %v745_v42  ;;  %v2307_v41 = vld [vmem:[#allocation16 + $0x44] ss:$8 sps:$4 sm:$0xff]  }
 0x4a6   :  { %v2149_v43 = vpop.f32.mrf.mxu0 }
 0x4a7   :  { %v2310_v43 = vld [vmem:[#allocation16 + $0x34] ss:$8 sps:$4 sm:$0xff]  }
 0x4a8   :  { %v831_v44 = vpop.f32.mrf.mxu0 }
 0x4a9   :  { %v832_v46 = vadd.f32 %v831_v44, %v745_v42  ;;  %v2305_v42 = vld [vmem:[#allocation16 + $0x40] ss:$8 sps:$4 sm:$0xff]   ;;  %v2313_v44 = vld [vmem:[#allocation16 + $0x24] ss:$8 sps:$4 sm:$0xff]  }
 0x4aa   :  { %v2150_v48 = vpop.f32.mrf.mxu0 }
 0x4ab   :  { %v835_v3 = vpack.c.bf16 %v832_v46, %v829_v45  ;;  %v2311_v45 = vld [vmem:[#allocation16 + $0x20] ss:$8 sps:$4 sm:$0xff]   ;;  %v994_v46 = vrot.slane %v2883_v37, %v2823_v15  ;;  %v989_v48 = vpop.permute.xlu1 %988 }
 0x4ad   :  { %2168 = vmatmul.mubr.bf16.vlgmr.msra.gmra.mxu1 %v835_v3  ;;  %v995_v49 = vmul.f32 %v994_v46, %v989_v48 }
 0x4ae   :  { %2187 = vmatprep.mubr.msk.bf16.mxu1 %vm2654_vm0, %v2653_v2  ;;  %2172 = vmatpush3.bf16.msra.mxu1 %v2288_v57 }
 0x4af   :  { %2173 = vmatprep.subr.bf16.mxu1 %v2653_v2 }
 0x4b2   :  { %2174 = vmatpush3.bf16.msra.mxu1 %v2289_v60  ;;  %v2314_v60 = vld [vmem:[#allocation16 + $0x10] ss:$8 sps:$4 sm:$0xff]  }
 0x4b3   :  { %2175 = vmatprep.subr.bf16.mxu1 %v2653_v2 }
 0x4b6   :  { %2176 = vmatpush3.bf16.msra.mxu1 %v2290_v61  ;;  %v2319_v61 = vld [vmem:[#allocation16 + $0x4] ss:$8 sps:$4 sm:$0xff]  }
 0x4b7   :  { %2177 = vmatprep.subr.bf16.mxu1 %v2653_v2 }
 0x4ba   :  { %2178 = vmatpush3.bf16.msra.mxu1 %v2291_v62  ;;  %v2317_v62 = vld [vmem:[#allocation16] ss:$8 sps:$4 sm:$0xff]  }
 0x4bb   :  { %2179 = vmatprep.subr.bf16.mxu1 %v2653_v2 }
 0x4be   :  { %2180 = vmatpush3.bf16.msra.mxu1 %v2292_v63  ;;  %v2322_v63 = vld [vmem:[#allocation16 + $0xf4] ss:$8 sps:$4 sm:$0xff]  }
 0x4bf   :  { %2181 = vmatprep.subr.bf16.mxu1 %v2653_v2 }
 0x4c2   :  { %2182 = vmatpush3.bf16.msra.mxu1 %v2293_v4 }
 0x4c3   :  { %2183 = vmatprep.subr.bf16.mxu1 %v2653_v2 }
 0x4c6   :  { %2184 = vmatpush3.bf16.msra.mxu1 %v2294_v28 }
 0x4c7   :  { %2185 = vmatprep.subr.bf16.mxu1 %v2653_v2  ;;  %v2308_v2 = vld [vmem:[#allocation16 + $0x30] ss:$8 sps:$4 sm:$0xff]  }
 0x4ca   :  { %2186 = vmatpush3.bf16.msra.mxu1 %v2295_v22 }
 0x56d   :  { %v922_v5 = vpop.f32.mrf.mxu1 }
 0x56e   :  { %v923_v8 = vadd.f32 %v922_v5, %v839_v1  ;;  %v2323_v5 = vld [vmem:[#allocation16 + $0xe0] ss:$8 sps:$4 sm:$0xff]  }
 0x56f   :  { %v2169_v11 = vpop.f32.mrf.mxu1 }
 0x570   :  { %v933_v12 = vmul.f32 %v931_v6, %v923_v8  ;;  %v2326_v8 = vld [vmem:[#allocation16 + $0xd0] ss:$8 sps:$4 sm:$0xff]   ;;  %v2329_v11 = vld [vmem:[#allocation16 + $0xc0] ss:$8 sps:$4 sm:$0xff]  }
 0x571   :  { %v925_v16 = vpop.f32.mrf.mxu1 }
 0x572   :  { %v926_v17 = vadd.f32 %v925_v16, %v839_v1  ;;  %v939_v18 = vadd.f32 %v938_v13, %v933_v12  ;;  %v2325_v1 = vld [vmem:[#allocation16 + $0xe4] ss:$8 sps:$4 sm:$0xff]   ;;  %v2334_v12 = vld [vmem:[#allocation16 + $0xb4] ss:$8 sps:$4 sm:$0xff]   ;;  %v2332_v13 = vld [vmem:[#allocation16 + $0xb0] ss:$8 sps:$4 sm:$0xff]  }
 0x573   :  { %v2170_v20 = vpop.f32.mrf.mxu1  ;;  %v2337_v16 = vld [vmem:[#allocation16 + $0xa4] ss:$8 sps:$4 sm:$0xff]  }
 0x574   :  { %v940_v21 = vmul.f32 %v931_v6, %v926_v17  ;;  %v2898_v40 = vmul.f32 %v945_v24, %v939_v18  ;;  %v2328_v6 = vld [vmem:[#allocation16 + $0xd4] ss:$8 sps:$4 sm:$0xff]   ;;  %v2335_v17 = vld [vmem:[#allocation16 + $0xa0] ss:$8 sps:$4 sm:$0xff]   ;;  %v2338_v20 = vld [vmem:[#allocation16 + $0x90] ss:$8 sps:$4 sm:$0xff]   ;;  %v1142_v24 = vrot.slane %v2883_v37, %v2804_v47 }
 0x575   :  { %v2340_v18 = vld [vmem:[#allocation16 + $0x94] ss:$8 sps:$4 sm:$0xff]   ;;  %v2919_v37 = vld [vmem:[%s2961_s10] sm:$0xff]  ;;  %s2660_s10 = smov [#allocation19]  }
 0x576   :  { %v942_v25 = vadd.f32 %v941_v23, %v940_v21  ;;  %v985_v19 = vpack.c.bf16 %v2898_v40, %v2898_v40  ;;  %v2343_v21 = vld [vmem:[#allocation16 + $0x84] ss:$8 sps:$4 sm:$0xff]   ;;  %v2341_v23 = vld [vmem:[#allocation16 + $0x80] ss:$8 sps:$4 sm:$0xff]   ;;  %s1815_s22 = sshll.u32 %s2660_s10, 4  ;;  %s1816_s22 = int_to_ptr.vmem [resolvable:$true] %s1815_s22 }
 0x577   :  { %s2603_s23 = scalar_lea.vmem %s1816_s22, 256  ;;  %p2608_p9 = scmp.lt.s32.totalorder %s1816_s22, %s1816_s22 }
 0x578   :  { %v2900_v26 = vmul.f32 %v950_v10, %v942_v25  ;;  %v2331_v10 = vld [vmem:[#allocation16 + $0xc4] ss:$8 sps:$4 sm:$0xff]   ;;  %p2604_p8 = scmp.ne.s32.totalorder %s1816_s22, %s2603_s23  ;;  %p2609_p10 = scmp.lt.s32.totalorder %s2603_s23, %s2603_s23 }
 0x57a   :  { %v986_v27 = vpack.c.bf16 %v2900_v26, %v2900_v26  ;;  %p2610_p11 = por %p2609_p10, %p2608_p9 }
 0x57c   :  { %1124 = vmatprep.mubr.bf16.mxu0 %v986_v27  ;;  %p2611_p12 = pnand %p2610_p11, %p2604_p8 }
 0x57d   :  { %1125 = vmatmul.mubr.bf16.vlgmr.msra.gmra.mxu0 %v985_v19 }
 0x57e   :  { %1455 = vmatpush1.bf16.msra.mxu0 %v2296_v35 }
 0x57f   :  { %1456 = vmatprep.subr.bf16.mxu0 %v2301_v30 }
 0x582   :  { %1457 = vmatpush1.bf16.msra.mxu0 %v2299_v31 }
 0x583   :  { %1458 = vmatprep.subr.bf16.mxu0 %v2304_v33 }
 0x586   :  { %1459 = vmatpush1.bf16.msra.mxu0 %v2302_v36 }
 0x587   :  { %1460 = vmatprep.subr.bf16.mxu0 %v2307_v41 }
 0x58a   :  { %1461 = vmatpush1.bf16.msra.mxu0 %v2305_v42 }
 0x58b   :  { %1462 = vmatprep.subr.bf16.mxu0 %v2310_v43  ;;  %v1279_v43 = vrot.slane %v2919_v37, %v2797_v39 }
 0x58e   :  { %1463 = vmatpush1.bf16.msra.mxu0 %v2308_v2  ;;  %v1283_v2 = vrot.slane %v2919_v37, %v2804_v47  ;;  %v2352_v47 = vld [vmem:[#allocation17 + $0x54] ss:$8 sps:$4 sm:$0xff]  }
 0x58f   :  { %1464 = vmatprep.subr.bf16.mxu0 %v2313_v44  ;;  %v1289_v44 = vrot.slane %v1279_v43, %v2797_v39  ;;  %v1535_v43 = vrot.slane %v2919_v37, %v2823_v15 }
 0x592   :  { %1465 = vmatpush1.bf16.msra.mxu0 %v2311_v45 }
 0x593   :  { %1466 = vmatprep.subr.bf16.mxu0 %v2316_v59  ;;  %v2361_v59 = vld [vmem:[#allocation17 + $0x24] ss:$8 sps:$4 sm:$0xff]  }
 0x596   :  { %1467 = vmatpush1.bf16.msra.mxu0 %v2314_v60  ;;  %v2359_v60 = vld [vmem:[#allocation17 + $0x20] ss:$8 sps:$4 sm:$0xff]  }
 0x597   :  { %1468 = vmatprep.subr.bf16.mxu0 %v2319_v61  ;;  %v2364_v61 = vld [vmem:[#allocation17 + $0x14] ss:$8 sps:$4 sm:$0xff]  }
 0x59a   :  { %1469 = vmatpush1.bf16.msra.mxu0 %v2317_v62  ;;  %v2362_v62 = vld [vmem:[#allocation17 + $0x10] ss:$8 sps:$4 sm:$0xff]  }
 0x59b   :  { %1470 = vmatprep.subr.bf16.mxu0 %v2322_v63  ;;  %v2367_v63 = vld [vmem:[#allocation17 + $0x4] ss:$8 sps:$4 sm:$0xff]  }
 0x59e   :  { %1471 = vmatpush2.bf16.msra.mxu0 %v2320_v0  ;;  %v2365_v0 = vld [vmem:[#allocation17] ss:$8 sps:$4 sm:$0xff]  }
 0x59f   :  { %1472 = vmatprep.subr.bf16.mxu0 %v2325_v1  ;;  %v2370_v1 = vld [vmem:[#allocation17 + $0xf4] ss:$8 sps:$4 sm:$0xff]  }
 0x5a2   :  { %1473 = vmatpush2.bf16.msra.mxu0 %v2323_v5  ;;  %v2368_v5 = vld [vmem:[#allocation17 + $0xf0] ss:$8 sps:$4 sm:$0xff]  }
 0x5a3   :  { %1474 = vmatprep.subr.bf16.mxu0 %v2328_v6 }
 0x5a6   :  { %1475 = vmatpush2.bf16.msra.mxu0 %v2326_v8 }
 0x5a7   :  { %1476 = vmatprep.subr.bf16.mxu0 %v2331_v10 }
 0x5aa   :  { %1477 = vmatpush2.bf16.msra.mxu0 %v2329_v11 }
 0x5ab   :  { %1478 = vmatprep.subr.bf16.mxu0 %v2334_v12 }
 0x5ae   :  { %1479 = vmatpush2.bf16.msra.mxu0 %v2332_v13 }
 0x5af   :  { %1480 = vmatprep.subr.bf16.mxu0 %v2337_v16 }
 0x5b2   :  { %1481 = vmatpush2.bf16.msra.mxu0 %v2335_v17  ;;  %v2373_v17 = vld [vmem:[#allocation17 + $0xe4] ss:$8 sps:$4 sm:$0xff]  }
 0x5b3   :  { %1482 = vmatprep.subr.bf16.mxu0 %v2340_v18  ;;  %v2371_v18 = vld [vmem:[#allocation17 + $0xe0] ss:$8 sps:$4 sm:$0xff]  }
 0x5b6   :  { %1483 = vmatpush2.bf16.msra.mxu0 %v2338_v20  ;;  %v2376_v20 = vld [vmem:[#allocation17 + $0xd4] ss:$8 sps:$4 sm:$0xff]  }
 0x5b7   :  { %1484 = vmatprep.subr.bf16.mxu0 %v2343_v21  ;;  %v2374_v21 = vld [vmem:[#allocation17 + $0xd0] ss:$8 sps:$4 sm:$0xff]  }
 0x5ba   :  { %1485 = vmatpush2.bf16.msra.mxu0 %v2341_v23  ;;  %v2379_v23 = vld [vmem:[#allocation17 + $0xc4] ss:$8 sps:$4 sm:$0xff]  }
 0x63d   :  { %v2036_v3 = vpop.f32.mrf.mxu0 }
 0x63f   :  { %v2037_v50 = vpop.f32.mrf.mxu0 }
 0x640   :  { %v2038_v51 = vadd.f32 %v2037_v50, %v2036_v3 }
 0x641   :  { %v2039_v53 = vpop.f32.mrf.mxu0 }
 0x642   :  { %v1127_v54 = vadd.f32 %v2038_v51, %v995_v49  ;;  %v2344_v51 = vld [vmem:[#allocation17 + $0x70] ss:$8 sps:$4 sm:$0xff]   ;;  %v2349_v53 = vld [vmem:[#allocation17 + $0x64] ss:$8 sps:$4 sm:$0xff]  }
 0x643   :  { %v2040_v55 = vpop.f32.mrf.mxu0 }
 0x644   :  { %v1136_v56 = vadd.f32 %v1135_v52, %v1127_v54  ;;  %v2346_v52 = vld [vmem:[#allocation17 + $0x74] ss:$8 sps:$4 sm:$0xff]   ;;  %v2347_v54 = vld [vmem:[#allocation17 + $0x60] ss:$8 sps:$4 sm:$0xff]   ;;  %v2350_v55 = vld [vmem:[#allocation17 + $0x50] ss:$8 sps:$4 sm:$0xff]  }
 0x645   :  { %1766 = vmatprep.subr.bf16.mxu1 %v2346_v52 }
 0x646   :  { %v1137_v57 = vmax.f32 %v1136_v56, 0.0  ;;  %v2353_v56 = vld [vmem:[#allocation17 + $0x40] ss:$8 sps:$4 sm:$0xff]  }
 0x648   :  { %v1138_v58 = vpack.c.bf16 %v1137_v57, %v1137_v57  ;;  %v2358_v57 = vld [vmem:[#allocation17 + $0x34] ss:$8 sps:$4 sm:$0xff]  }
 0x64a   :  { %2188 = vmatmul.mubr.bf16.vlgmr.msra.gmra.mxu1 %v1138_v58  ;;  %v2356_v58 = vld [vmem:[#allocation17 + $0x30] ss:$8 sps:$4 sm:$0xff]  }
 0x64b   :  { %1767 = vmatpush1.bf16.msra.mxu1 %v2344_v51 }
 0x64c   :  { %1768 = vmatprep.subr.bf16.mxu1 %v2349_v53 }
 0x64f   :  { %1769 = vmatpush1.bf16.msra.mxu1 %v2347_v54  ;;  %v1595_v54 = vrot.slane %v2919_v37, %v649_v9 }
 0x650   :  { %1770 = vmatprep.subr.bf16.mxu1 %v2352_v47 }
 0x653   :  { %1771 = vmatpush1.bf16.msra.mxu1 %v2350_v55 }
 0x70a   :  { %v1225_v25 = vpop.f32.mrf.mxu1 }
 0x70b   :  { %v1226_v27 = vadd.f32 %v1225_v25, %v1142_v24  ;;  %v2377_v24 = vld [vmem:[#allocation17 + $0xc0] ss:$8 sps:$4 sm:$0xff]   ;;  %v2382_v25 = vld [vmem:[#allocation17 + $0xb4] ss:$8 sps:$4 sm:$0xff]  }
 0x70c   :  { %v2189_v19 = vpop.f32.mrf.mxu1 }
 0x70d   :  { %v1901_v4 = vmul.f32 -1.442695, %v1226_v27  ;;  %v2380_v27 = vld [vmem:[#allocation17 + $0xb0] ss:$8 sps:$4 sm:$0xff]   ;;  %v2385_v19 = vld [vmem:[#allocation17 + $0xa4] ss:$8 sps:$4 sm:$0xff]  }
 0x70e   :  { %v1228_v28 = vpop.f32.mrf.mxu1 }
 0x70f   :  { %2396 = vpow2.f32 %v1901_v4  ;;  %v2383_v4 = vld [vmem:[#allocation17 + $0xa0] ss:$8 sps:$4 sm:$0xff]   ;;  %v2388_v28 = vld [vmem:[#allocation17 + $0x94] ss:$8 sps:$4 sm:$0xff]  }
 0x710   :  { %v2190_v22 = vpop.f32.mrf.mxu1 }
 0x711   :  { %v2386_v22 = vld [vmem:[#allocation17 + $0x90] ss:$8 sps:$4 sm:$0xff]  }
 0x71c   :  { %v2397_v35 = vpop.eup %2396 }
 0x71d   :  { %v1234_v29 = vadd.f32 1.0, %v2397_v35  ;;  %v2391_v35 = vld [vmem:[#allocation17 + $0x84] ss:$8 sps:$4 sm:$0xff]  }
 0x71f   :  { %2398 = vrcp.f32 %v1234_v29  ;;  %v2389_v29 = vld [vmem:[#allocation17 + $0x80] ss:$8 sps:$4 sm:$0xff]  }
 0x72c   :  { %v2399_v30 = vpop.eup %2398 }
 0x72d   :  { %v1238_v31 = vsub.f32 1.0, %v2399_v30  ;;  %v1237_v33 = vmul.f32 %v2399_v30, %v2898_v40  ;;  %v1293_v40 = vrot.slane %v1283_v2, %v2797_v39  ;;  %v2355_v39 = vld [vmem:[#allocation17 + $0x44] ss:$8 sps:$4 sm:$0xff]  }
 0x72e   :  { %1772 = vmatprep.subr.bf16.mxu1 %v2355_v39 }
 0x72f   :  { %v1239_v36 = vmul.f32 %v1238_v31, %v2900_v26  ;;  %v1273_v42 = vpack.c.bf16 %v1237_v33, %v1237_v33  ;;  %1773 = vmatpush1.bf16.msra.mxu1 %v2353_v56 }
 0x730   :  { %1774 = vmatprep.subr.bf16.mxu1 %v2358_v57 }
 0x731   :  { %v1274_v41 = vpack.c.bf16 %v1239_v36, %v1239_v36  ;;  %v1519_v36 = vrot.slane %v2919_v37, %v637_v32  ;;  %v1545_v32 = vrot.slane %v1535_v43, %v2823_v15 }
 0x733   :  { %1486 = vmatprep.mubr.bf16.mxu0 %v1274_v41  ;;  %1775 = vmatpush1.bf16.msra.mxu1 %v2356_v58  ;;  %v1515_v41 = vrot.slane %v2919_v37, %v2820_v14  ;;  %v1529_v2 = vrot.slane %v1519_v36, %v2820_v14 }
 0x734   :  { %1487 = vmatmul.mubr.bf16.vlgmr.msra.gmra.mxu0 %v1273_v42  ;;  %1776 = vmatprep.subr.bf16.mxu1 %v2361_v59  ;;  %v1539_v42 = vrot.slane %v2919_v37, %v642_v34 }
 0x737   :  { %1777 = vmatpush1.bf16.msra.mxu1 %v2359_v60 }
 0x738   :  { %1778 = vmatprep.subr.bf16.mxu1 %v2364_v61 }
 0x73b   :  { %1779 = vmatpush1.bf16.msra.mxu1 %v2362_v62 }
 0x73c   :  { %1780 = vmatprep.subr.bf16.mxu1 %v2367_v63 }
 0x73f   :  { %1781 = vmatpush1.bf16.msra.mxu1 %v2365_v0 }
 0x740   :  { %1782 = vmatprep.subr.bf16.mxu1 %v2370_v1 }
 0x743   :  { %1783 = vmatpush2.bf16.msra.mxu1 %v2368_v5 }
 0x744   :  { %1784 = vmatprep.subr.bf16.mxu1 %v2373_v17 }
 0x747   :  { %1785 = vmatpush2.bf16.msra.mxu1 %v2371_v18 }
 0x748   :  { %1786 = vmatprep.subr.bf16.mxu1 %v2376_v20 }
 0x74b   :  { %1787 = vmatpush2.bf16.msra.mxu1 %v2374_v21 }
 0x74c   :  { %1788 = vmatprep.subr.bf16.mxu1 %v2379_v23 }
 0x74f   :  { %1789 = vmatpush2.bf16.msra.mxu1 %v2377_v24 }
 0x750   :  { %1790 = vmatprep.subr.bf16.mxu1 %v2382_v25 }
 0x753   :  { %1791 = vmatpush2.bf16.msra.mxu1 %v2380_v27 }
 0x754   :  { %1792 = vmatprep.subr.bf16.mxu1 %v2385_v19 }
 0x757   :  { %1793 = vmatpush2.bf16.msra.mxu1 %v2383_v4 }
 0x758   :  { %1794 = vmatprep.subr.bf16.mxu1 %v2388_v28 }
 0x75b   :  { %1795 = vmatpush2.bf16.msra.mxu1 %v2386_v22 }
 0x75c   :  { %1796 = vmatprep.subr.bf16.mxu1 %v2391_v35 }
 0x75f   :  { %1797 = vmatpush2.bf16.msra.mxu1 %v2389_v29 }
 0x7f4   :  { %v1488_v26 = vpop.f32.mrf.mxu0 }
 0x7f5   :  { %v1489_v46 = vadd.f32 %v1488_v26, %v1289_v44  ;;  %v1525_v44 = vrot.slane %v1515_v41, %v2820_v14  ;;  %v1591_v14 = vrot.slane %v2919_v37, %v2863_v7 }
 0x7f6   :  { %v1490_v45 = vpop.f32.mrf.mxu0 }
 0x7f7   :  { %v1491_v48 = vadd.f32 %v1490_v45, %v1293_v40  ;;  %v1549_v45 = vrot.slane %v1539_v42, %v2823_v15  ;;  %v1601_v47 = vrot.slane %v1591_v14, %v2863_v7  ;;  %v1605_v15 = vrot.slane %v1595_v54, %v2863_v7 }
 0x7f8   :  { %v1492_v3 = vpop.f32.mrf.mxu0 }
 0x7f9   :  { %v1495_v49 = vadd.f32 %v1491_v48, %v1489_v46 }
 0x7fa   :  { %v1493_v50 = vpop.f32.mrf.mxu0 }
 0x7fb   :  { %1496 = vadd.xlane.f32.xlu1 %v1495_v49 }
 0x884   :  { %v1497_v6 = vpop.xlane.xlu1 %1496 }
 0x885   :  { %v1499_v8 = vmul.f32 0.00390625, %v1497_v6 }
 0x887   :  { %v1500_v10 = vsub.f32 %v1489_v46, %v1499_v8  ;;  %v1501_v11 = vsub.f32 %v1491_v48, %v1499_v8 }
 0x889   :  { %v1502_v12 = vmul.f32 %v1500_v10, %v1500_v10  ;;  %v1503_v13 = vmul.f32 %v1501_v11, %v1501_v11 }
 0x88b   :  { %v1504_v16 = vadd.f32 %v1503_v13, %v1502_v12 }
 0x88d   :  { %1505 = vadd.xlane.f32.xlu0 %v1504_v16 }
 0x916   :  { %v1506_v30 = vpop.xlane.xlu0 %1505 }
 0x917   :  { %v1507_v31 = vmul.f32 0.00390625, %v1506_v30 }
 0x919   :  { %v1508_v33 = vadd.f32 1e-05, %v1507_v31 }
 0x91b   :  { %2400 = vrsqrt.f32 %v1508_v33 }
 0x928   :  { %v2401_v40 = vpop.eup %2400 }
 0x929   :  { %v1511_v26 = vmul.f32 %v2401_v40, %v1501_v11  ;;  %v1510_v46 = vmul.f32 %v2401_v40, %v1500_v10 }
 0x92b   :  { %v1531_v48 = vmul.f32 %v1529_v2, %v1511_v26  ;;  %v1530_v3 = vmul.f32 %v1525_v44, %v1510_v46 }
 0x92d   :  { %v1551_v49 = vadd.f32 %v1549_v45, %v1531_v48  ;;  %v1550_v50 = vadd.f32 %v1545_v32, %v1530_v3 }
 0x92f   :  { %v1553_v51 = vmax.f32 %v1551_v49, 0.0  ;;  %v1552_v34 = vmax.f32 %v1550_v50, 0.0 }
 0x931   :  { %v1587_v52 = vpack.c.bf16 %v1553_v51, %v1553_v51  ;;  %v1586_v53 = vpack.c.bf16 %v1552_v34, %v1552_v34 }
 0x933   :  { %1798 = vmatprep.mubr.bf16.mxu1 %v1587_v52 }
 0x934   :  { %1799 = vmatmul.mubr.bf16.vlgmr.msra.gmra.mxu1 %v1586_v53 }
 0x9f4   :  { %v1800_v55 = vpop.f32.mrf.mxu1 }
 0x9f5   :  { %v1801_v39 = vadd.f32 %v1800_v55, %v1601_v47 }
 0x9f6   :  { %v1802_v56 = vpop.f32.mrf.mxu1 }
 0x9f7   :  { %1807 = vst [vmem:[#allocation19] sm:$0xff] %v1801_v39  ;;  %v1803_v57 = vadd.f32 %v1802_v56, %v1605_v15 }
 0x9f8   :  { %v1804_v58 = vpop.f32.mrf.mxu1 }
 0x9f9   :  { %1808 = vst [vmem:[#allocation19 + $0x8] sm:$0xff] %v1803_v57 }
 0x9fa   :  { %v1805_v59 = vpop.f32.mrf.mxu1 }
 0x9fb   :  { %2614 = shalt.err (!%p2611_p12)
}
 0x9fc   :  { %1818 = dma.vmem_to_hbm [thread:$0]  %s1816_s22, 256, %s2962_s11, [#allocation4]  }
 0x9fd   :  { %2635 = dma.done.wait [#allocation4], 256  }
 0x9fe   :  { %2636 = vsyncadd [#allocation4], 4294967040 }
 0x9ff   :  { %1822 = vsyncpa [#allocation3], 1 }
 0xa00   :  { %1823 = vsyncpa [#allocation6], 1 }
 0xa01   :  { %1824 = vsyncpa [#allocation9], 1 }
 0xa02   :  { %1825 = vsyncpa [#allocation12], 1 }
 0xa03   :  { %1826 = vsyncpa [#allocation15], 1 }
 0xa04   :  { %1827 = vsyncpa [#allocation18], 1 }
 0xa05   :  { %1828 = vsyncpa [#allocation4], 1 }

</bundles_post_ra>
